<compile_context>
chip_gen: v7x
topology: tpu7x:2x2x1
jax: 0.10.0
libtpu: 0.0.40
codegen_flags: <defaults>
</compile_context>

<pallas_src>
import jax
import jax.numpy as jnp
import numpy as np
from jax import lax
from jax.experimental import pallas as pl
from jax.experimental.pallas import tpu as pltpu


_TAPS = tuple((kh, kw) for kh in range(3) for kw in range(3))


def _vmem_limit_bytes():
    """Generation-aware scoped-VMEM limit with a safe fallback."""
    try:
        cap = pltpu.get_tpu_info().vmem_capacity_bytes
        # 48 MiB on 128 MiB parts (v5e/v6e), 40 MiB on v7x's 64 MiB/TC.
        return int(min(48 * 1024 * 1024, (cap * 5) // 8))
    except Exception:
        return 32 * 1024 * 1024


# ---------------------------------------------------------------------------
# Fused BasicBlock kernel
# ---------------------------------------------------------------------------
def _make_basicblock_kernel(*, stride, ho, wo, downsample, compute_dtype):
    f32 = jnp.float32
    m = ho * wo

    def kernel(x1_ref, w1_ref, b1_ref, w2_ref, b2_ref, res_ref, *rest):
        if downsample:
            wd_ref, bd_ref, o_ref, o1p_ref = rest
        else:
            o_ref, o1p_ref = rest

        planes = w1_ref.shape[1]
        cout = w2_ref.shape[1]

        # ---- conv1: single K = 9*cin MXU matmul over an in-VMEM im2col ----
        # One upcast of the whole tile; every tap is a unit-stride slice
        # (stride-2 handled by the wrapper's space-to-depth phase split).
        xin = x1_ref[...].astype(f32)
        if stride == 1:
            x0 = xin[0]                                   # (h+2, w+2, cin)
            taps = [x0[kh:kh + ho, kw:kw + wo, :] for kh, kw in _TAPS]
        else:
            # xin: (4, ho+1, wo+1, cin); phase = (row parity)*2 + (col parity)
            taps = [xin[(kh % 2) * 2 + (kw % 2),
                        kh // 2:kh // 2 + ho,
                        kw // 2:kw // 2 + wo, :]
                    for kh, kw in _TAPS]
        col1 = jnp.concatenate(taps, axis=-1).reshape(m, -1).astype(compute_dtype)
        y1 = jnp.dot(col1, w1_ref[...], preferred_element_type=f32)
        y1 = jnp.maximum(y1 + b1_ref[...], 0.0)

        # ---- out1 lives in a padded VMEM scratch (no HBM round trip) ------
        o1p_ref[...] = jnp.zeros((ho + 2, wo + 2, planes), o1p_ref.dtype)
        o1p_ref[1:1 + ho, 1:1 + wo, :] = (
            y1.reshape(ho, wo, planes).astype(o1p_ref.dtype))

        # ---- conv2: single K = 9*planes MXU matmul ------------------------
        o1 = o1p_ref[...].astype(f32)                     # (ho+2, wo+2, planes)
        taps2 = [o1[kh:kh + ho, kw:kw + wo, :] for kh, kw in _TAPS]
        col2 = jnp.concatenate(taps2, axis=-1).reshape(m, -1).astype(compute_dtype)
        y2 = jnp.dot(col2, w2_ref[...], preferred_element_type=f32) + b2_ref[...]

        # ---- residual (identity or fused 1x1 strided conv + BN) + relu ----
        if downsample:
            xs = res_ref[...][0].reshape(m, -1)           # pre-strided (ho*wo, cin)
            res = jnp.dot(xs, wd_ref[...], preferred_element_type=f32) + bd_ref[...]
            out = jnp.maximum(y2 + res, 0.0).reshape(ho, wo, cout)
        else:
            out = jnp.maximum(y2.reshape(ho, wo, cout)
                              + res_ref[...][0].astype(f32), 0.0)

        o_ref[...] = out[None].astype(o_ref.dtype)

    return kernel


# ---------------------------------------------------------------------------
# BasicBlock forward (wrapper: NCHW in / NCHW out, like PyTorch)
# ---------------------------------------------------------------------------
def basic_block_forward(x_nchw, prep, *, stride=1, downsample=False,
                        compute_dtype=jnp.bfloat16, out_dtype=None):
    assert stride in (1, 2), "only stride 1 or 2 supported (ResNet uses these)"
    out_dtype = compute_dtype if out_dtype is None else out_dtype

    x = jnp.transpose(x_nchw, (0, 2, 3, 1)).astype(compute_dtype)   # -> NHWC
    n, h, w, cin = x.shape
    planes = prep["w1"].shape[1]
    cout = prep["w2"].shape[1]
    if downsample:
        assert "wd" in prep, "downsample=True requires downsample parameters"
    else:
        assert stride == 1 and cin == cout, (
            "identity residual requires stride=1 and inplanes == planes*expansion")
    ho = (h - 1) // stride + 1
    wo = (w - 1) // stride + 1

    # conv1 operand: padded; for stride 2 additionally space-to-depth split
    # into 4 phase planes so every in-kernel tap is a unit-stride slice.
    if stride == 1:
        x1 = jnp.pad(x, ((0, 0), (1, 1), (1, 1), (0, 0)))
        x1_spec = pl.BlockSpec((1, h + 2, w + 2, cin), lambda i: (i, 0, 0, 0))
    else:
        xp = jnp.pad(x, ((0, 0), (1, 1 + h % 2), (1, 1 + w % 2), (0, 0)))
        hp, wp = xp.shape[1], xp.shape[2]                 # even; hp//2 == ho+1
        x1 = xp.reshape(n, hp // 2, 2, wp // 2, 2, cin)
        x1 = x1.transpose(0, 2, 4, 1, 3, 5).reshape(n * 4, hp // 2, wp // 2, cin)
        x1_spec = pl.BlockSpec((4, hp // 2, wp // 2, cin), lambda i: (i, 0, 0, 0))

    # residual operand: identity tile, or pre-strided x for the fused 1x1 conv
    if downsample:
        res = x[:, ::stride, ::stride, :]                 # (n, ho, wo, cin)
        res_spec = pl.BlockSpec((1, ho, wo, cin), lambda i: (i, 0, 0, 0))
    else:
        res = x
        res_spec = pl.BlockSpec((1, ho, wo, cout), lambda i: (i, 0, 0, 0))

    in_specs = [
        x1_spec,
        pl.BlockSpec((9 * cin, planes), lambda i: (0, 0)),
        pl.BlockSpec((1, planes), lambda i: (0, 0)),
        pl.BlockSpec((9 * planes, cout), lambda i: (0, 0)),
        pl.BlockSpec((1, cout), lambda i: (0, 0)),
        res_spec,
    ]
    operands = [x1, prep["w1"], prep["b1"].reshape(1, planes),
                prep["w2"], prep["b2"].reshape(1, cout), res]
    if downsample:
        in_specs += [pl.BlockSpec((cin, cout), lambda i: (0, 0)),
                     pl.BlockSpec((1, cout), lambda i: (0, 0))]
        operands += [prep["wd"], prep["bd"].reshape(1, cout)]

    flops = 2 * n * ho * wo * (9 * cin * planes + 9 * planes * cout
                               + (cin * cout if downsample else 0))
    out_bytes = n * ho * wo * cout * np.dtype(out_dtype).itemsize
    bytes_accessed = (sum(int(o.size) * o.dtype.itemsize for o in operands)
                      + out_bytes)

    out = pl.pallas_call(
        _make_basicblock_kernel(stride=stride, ho=ho, wo=wo,
                                downsample=downsample,
                                compute_dtype=compute_dtype),
        out_shape=jax.ShapeDtypeStruct((n, ho, wo, cout), out_dtype),
        grid_spec=pltpu.PrefetchScalarGridSpec(
            num_scalar_prefetch=0,
            grid=(n,),
            in_specs=in_specs,
            out_specs=pl.BlockSpec((1, ho, wo, cout), lambda i: (i, 0, 0, 0)),
            scratch_shapes=[pltpu.VMEM((ho + 2, wo + 2, planes), compute_dtype)],
        ),
        compiler_params=pltpu.CompilerParams(
            dimension_semantics=("parallel",),
            vmem_limit_bytes=_vmem_limit_bytes(),
        ),
        cost_estimate=pl.CostEstimate(flops=int(flops), transcendentals=0,
                                      bytes_accessed=int(bytes_accessed)),
    )(*operands)

    return jnp.transpose(out, (0, 3, 1, 2))               # -> NCHW


# ---------------------------------------------------------------------------
# Deterministic parameter construction + BN folding
# ---------------------------------------------------------------------------
def make_params(key, inplanes, planes, downsample):
    """Raw parameters mirroring the nn.Module's Conv2d/BatchNorm2d shapes."""
    expansion = 1
    cout = planes * expansion
    ks = jax.random.split(key, 6)

    def conv_w(k, kh, kw, ci, co):                        # HWIO
        fan_in = float(kh * kw * ci)
        return jax.random.normal(k, (kh, kw, ci, co), jnp.float32) / fan_in ** 0.5

    def bn(k, c, eps=1e-5):
        kg, kb, km, kv = jax.random.split(k, 4)
        return dict(
            gamma=1.0 + 0.1 * jax.random.normal(kg, (c,), jnp.float32),
            beta=0.1 * jax.random.normal(kb, (c,), jnp.float32),
            mean=0.1 * jax.random.normal(km, (c,), jnp.float32),
            var=1.0 + 0.1 * jax.random.uniform(kv, (c,), jnp.float32),
            eps=eps)

    p = {
        "w1": conv_w(ks[0], 3, 3, inplanes, planes), "bn1": bn(ks[1], planes),
        "w2": conv_w(ks[2], 3, 3, planes, cout),     "bn2": bn(ks[3], cout),
    }
    if downsample:
        p["wd"] = conv_w(ks[4], 1, 1, inplanes, cout)[0, 0]   # (cin, cout)
        p["bnd"] = bn(ks[5], cout)
    return p


def prepare_params(p, *, compute_dtype=jnp.bfloat16):
    """Fold BN (inference affine) into the conv weights; reshape for im2col."""
    def fold(w, bn):
        scale = bn["gamma"] * lax.rsqrt(bn["var"] + bn["eps"])
        shift = bn["beta"] - bn["mean"] * scale
        return (w * scale).astype(compute_dtype), shift.astype(jnp.float32)

    prep = {}
    w1, prep["b1"] = fold(p["w1"], p["bn1"])
    prep["w1"] = w1.reshape(-1, w1.shape[-1])             # (9*cin, planes)
    w2, prep["b2"] = fold(p["w2"], p["bn2"])
    prep["w2"] = w2.reshape(-1, w2.shape[-1])             # (9*planes, cout)
    if "wd" in p:
        prep["wd"], prep["bd"] = fold(p["wd"], p["bnd"])  # (cin, cout)
    return prep


# ---------------------------------------------------------------------------
# Pure-JAX reference on the same folded+quantized parameters
# ---------------------------------------------------------------------------
def reference_forward(x_nchw, prep, *, stride=1, downsample=False,
                      compute_dtype=jnp.bfloat16):
    f32 = jnp.float32
    hi = lax.Precision.HIGHEST
    dn = ("NHWC", "HWIO", "NHWC")
    x = jnp.transpose(x_nchw, (0, 2, 3, 1)).astype(compute_dtype).astype(f32)
    cin = x.shape[-1]
    planes = prep["w1"].shape[1]
    cout = prep["w2"].shape[1]

    w1 = prep["w1"].astype(f32).reshape(3, 3, cin, planes)
    o = lax.conv_general_dilated(x, w1, (stride, stride), ((1, 1), (1, 1)),
                                 dimension_numbers=dn, precision=hi)
    o = jax.nn.relu(o + prep["b1"])
    o = o.astype(compute_dtype).astype(f32)               # out1 stored as bf16

    w2 = prep["w2"].astype(f32).reshape(3, 3, planes, cout)
    o = lax.conv_general_dilated(o, w2, (1, 1), ((1, 1), (1, 1)),
                                 dimension_numbers=dn, precision=hi)
    o = o + prep["b2"]

    if downsample:
        wd = prep["wd"].astype(f32)[None, None]
        res = lax.conv_general_dilated(x, wd, (stride, stride), "VALID",
                                       dimension_numbers=dn, precision=hi)
        res = res + prep["bd"]
    else:
        res = x
    return jnp.transpose(jax.nn.relu(o + res), (0, 3, 1, 2))


if __name__ == "__main__":
    key = jax.random.PRNGKey(0)
    kx, kpa, kpb = jax.random.split(key, 3)

    n, inplanes, planes, h, w = 2, 4, 4, 16, 16
    x = jax.random.normal(kx, (n, inplanes, h, w), jnp.float32)

    # Config A: stride-2 downsample block.
    raw_a = make_params(kpa, inplanes, planes, downsample=True)
    prep_a = prepare_params(raw_a)
    out_a = jax.block_until_ready(
        basic_block_forward(x, prep_a, stride=2, downsample=True))
    ref_a = reference_forward(x, prep_a, stride=2, downsample=True)
    assert out_a.shape == (n, planes, h // 2, w // 2)
    out_a32 = out_a.astype(jnp.float32)
    # bf16 output + bf16 MXU operands -> loose-ish tolerance.
    assert jnp.allclose(out_a32, ref_a, atol=3e-2, rtol=3e-2), (
        "downsample/stride-2 config mismatch: max |diff| = "
        f"{float(jnp.max(jnp.abs(out_a32 - ref_a)))}")

    # Config B: identity residual (stride 1, inplanes == planes * expansion).
    raw_b = make_params(kpb, inplanes, planes, downsample=False)
    prep_b = prepare_params(raw_b)
    out_b = jax.block_until_ready(
        basic_block_forward(x, prep_b, stride=1, downsample=False))
    ref_b = reference_forward(x, prep_b, stride=1, downsample=False)
    assert out_b.shape == (n, planes, h, w)
    out_b32 = out_b.astype(jnp.float32)
    assert jnp.allclose(out_b32, ref_b, atol=3e-2, rtol=3e-2), (
        "identity config mismatch: max |diff| = "
        f"{float(jnp.max(jnp.abs(out_b32 - ref_b)))}")

    print("KERNEL_OK")
</pallas_src>

<mosaic_0001>
module attributes {stable_mosaic.version = 11 : i64} {
  func.func @kernel(%arg0: i32, %arg1: memref<4x9x9x4xbf16, #tpu.memory_space<vmem>>, %arg2: memref<36x4xbf16, #tpu.memory_space<vmem>>, %arg3: memref<1x4xf32, #tpu.memory_space<vmem>>, %arg4: memref<36x4xbf16, #tpu.memory_space<vmem>>, %arg5: memref<1x4xf32, #tpu.memory_space<vmem>>, %arg6: memref<1x8x8x4xbf16, #tpu.memory_space<vmem>>, %arg7: memref<4x4xbf16, #tpu.memory_space<vmem>>, %arg8: memref<1x4xf32, #tpu.memory_space<vmem>>, %arg9: memref<1x8x8x4xbf16, #tpu.memory_space<vmem>>, %arg10: memref<10x10x4xbf16, #tpu.memory_space<vmem>>) attributes {dimension_semantics = [#tpu.dimension_semantics<parallel>], iteration_bounds = array<i64: 2>, scalar_prefetch = 0 : i64, scratch_operands = 1 : i64, tpu.core_type = #tpu.core_type<tc>, window_params = [{transform_indices = @transform_0, window_bounds = array<i64: 4, 9, 9, 4>}, {pipeline_mode = #tpu.pipeline_mode<synchronous>, transform_indices = @transform_1, window_bounds = array<i64: 36, 4>}, {pipeline_mode = #tpu.pipeline_mode<synchronous>, transform_indices = @transform_2, window_bounds = array<i64: 1, 4>}, {pipeline_mode = #tpu.pipeline_mode<synchronous>, transform_indices = @transform_3, window_bounds = array<i64: 36, 4>}, {pipeline_mode = #tpu.pipeline_mode<synchronous>, transform_indices = @transform_4, window_bounds = array<i64: 1, 4>}, {transform_indices = @transform_5, window_bounds = array<i64: 1, 8, 8, 4>}, {pipeline_mode = #tpu.pipeline_mode<synchronous>, transform_indices = @transform_6, window_bounds = array<i64: 4, 4>}, {pipeline_mode = #tpu.pipeline_mode<synchronous>, transform_indices = @transform_7, window_bounds = array<i64: 1, 4>}, {transform_indices = @transform_8, window_bounds = array<i64: 1, 8, 8, 4>}]} {
    %c0 = arith.constant 0 : index
    %c0_0 = arith.constant 0 : index
    %c0_1 = arith.constant 0 : index
    %c0_2 = arith.constant 0 : index
    %0 = vector.load %arg1[%c0, %c0_0, %c0_1, %c0_2] : memref<4x9x9x4xbf16, #tpu.memory_space<vmem>>, vector<4x9x9x4xbf16>
    %1 = arith.extf %0 : vector<4x9x9x4xbf16> to vector<4x9x9x4xf32>
    %2 = vector.extract_strided_slice %1 {offsets = [0, 0, 0, 0], sizes = [1, 8, 8, 4], strides = [1, 1, 1, 1]} : vector<4x9x9x4xf32> to vector<1x8x8x4xf32>
    %3 = vector.shape_cast %2 : vector<1x8x8x4xf32> to vector<8x8x4xf32>
    %4 = vector.extract_strided_slice %1 {offsets = [1, 0, 0, 0], sizes = [1, 8, 8, 4], strides = [1, 1, 1, 1]} : vector<4x9x9x4xf32> to vector<1x8x8x4xf32>
    %5 = vector.shape_cast %4 : vector<1x8x8x4xf32> to vector<8x8x4xf32>
    %6 = vector.extract_strided_slice %1 {offsets = [0, 0, 1, 0], sizes = [1, 8, 8, 4], strides = [1, 1, 1, 1]} : vector<4x9x9x4xf32> to vector<1x8x8x4xf32>
    %7 = vector.shape_cast %6 : vector<1x8x8x4xf32> to vector<8x8x4xf32>
    %8 = vector.extract_strided_slice %1 {offsets = [2, 0, 0, 0], sizes = [1, 8, 8, 4], strides = [1, 1, 1, 1]} : vector<4x9x9x4xf32> to vector<1x8x8x4xf32>
    %9 = vector.shape_cast %8 : vector<1x8x8x4xf32> to vector<8x8x4xf32>
    %10 = vector.extract_strided_slice %1 {offsets = [3, 0, 0, 0], sizes = [1, 8, 8, 4], strides = [1, 1, 1, 1]} : vector<4x9x9x4xf32> to vector<1x8x8x4xf32>
    %11 = vector.shape_cast %10 : vector<1x8x8x4xf32> to vector<8x8x4xf32>
    %12 = vector.extract_strided_slice %1 {offsets = [2, 0, 1, 0], sizes = [1, 8, 8, 4], strides = [1, 1, 1, 1]} : vector<4x9x9x4xf32> to vector<1x8x8x4xf32>
    %13 = vector.shape_cast %12 : vector<1x8x8x4xf32> to vector<8x8x4xf32>
    %14 = vector.extract_strided_slice %1 {offsets = [0, 1, 0, 0], sizes = [1, 8, 8, 4], strides = [1, 1, 1, 1]} : vector<4x9x9x4xf32> to vector<1x8x8x4xf32>
    %15 = vector.shape_cast %14 : vector<1x8x8x4xf32> to vector<8x8x4xf32>
    %16 = vector.extract_strided_slice %1 {offsets = [1, 1, 0, 0], sizes = [1, 8, 8, 4], strides = [1, 1, 1, 1]} : vector<4x9x9x4xf32> to vector<1x8x8x4xf32>
    %17 = vector.shape_cast %16 : vector<1x8x8x4xf32> to vector<8x8x4xf32>
    %18 = vector.extract_strided_slice %1 {offsets = [0, 1, 1, 0], sizes = [1, 8, 8, 4], strides = [1, 1, 1, 1]} : vector<4x9x9x4xf32> to vector<1x8x8x4xf32>
    %19 = vector.shape_cast %18 : vector<1x8x8x4xf32> to vector<8x8x4xf32>
    %20 = tpu.concatenate %3, %5, %7, %9, %11, %13, %15, %17, %19 in 2 : vector<8x8x4xf32>, vector<8x8x4xf32>, vector<8x8x4xf32>, vector<8x8x4xf32>, vector<8x8x4xf32>, vector<8x8x4xf32>, vector<8x8x4xf32>, vector<8x8x4xf32>, vector<8x8x4xf32> -> vector<8x8x36xf32>
    %21 = vector.shape_cast %20 : vector<8x8x36xf32> to vector<64x36xf32>
    %22 = arith.truncf %21 : vector<64x36xf32> to vector<64x36xbf16>
    %c0_3 = arith.constant 0 : index
    %c0_4 = arith.constant 0 : index
    %23 = vector.load %arg2[%c0_3, %c0_4] : memref<36x4xbf16, #tpu.memory_space<vmem>>, vector<36x4xbf16>
    %cst = arith.constant dense<0.000000e+00> : vector<64x4xf32>
    %24 = tpu.matmul %22, %23, %cst {dimension_numbers = #tpu.dot_dimension_numbers<[1], [0], [0], [1], [0, 0, 1, 1], [], []>} : vector<64x36xbf16>, vector<36x4xbf16>, vector<64x4xf32> -> vector<64x4xf32>
    %c0_5 = arith.constant 0 : index
    %c0_6 = arith.constant 0 : index
    %25 = vector.load %arg3[%c0_5, %c0_6] : memref<1x4xf32, #tpu.memory_space<vmem>>, vector<1x4xf32>
    %26 = vector.broadcast %25 : vector<1x4xf32> to vector<64x4xf32>
    %27 = arith.addf %24, %26 : vector<64x4xf32>
    %cst_7 = arith.constant 0.000000e+00 : f32
    %28 = vector.broadcast %cst_7 : f32 to vector<64x4xf32>
    %29 = arith.maximumf %27, %28 : vector<64x4xf32>
    %cst_8 = arith.constant 0.000000e+00 : bf16
    %30 = vector.broadcast %cst_8 : bf16 to vector<10x10x4xbf16>
    %c0_9 = arith.constant 0 : index
    %c0_10 = arith.constant 0 : index
    %c0_11 = arith.constant 0 : index
    %31 = vector.load %arg10[%c0_9, %c0_10, %c0_11] : memref<10x10x4xbf16, #tpu.memory_space<vmem>>, vector<10x10x4xbf16>
    tpu.vector_store %arg10[%c0_9, %c0_10, %c0_11], %30 {strides = array<i32>} : memref<10x10x4xbf16, #tpu.memory_space<vmem>>, vector<10x10x4xbf16>,
    %32 = vector.shape_cast %29 : vector<64x4xf32> to vector<8x8x4xf32>
    %33 = arith.truncf %32 : vector<8x8x4xf32> to vector<8x8x4xbf16>
    %c1 = arith.constant 1 : index
    %c1_12 = arith.constant 1 : index
    %c0_13 = arith.constant 0 : index
    %34 = vector.load %arg10[%c1, %c1_12, %c0_13] : memref<10x10x4xbf16, #tpu.memory_space<vmem>>, vector<8x8x4xbf16>
    tpu.vector_store %arg10[%c1, %c1_12, %c0_13], %33 {strides = array<i32>} : memref<10x10x4xbf16, #tpu.memory_space<vmem>>, vector<8x8x4xbf16>,
    %c0_14 = arith.constant 0 : index
    %c0_15 = arith.constant 0 : index
    %c0_16 = arith.constant 0 : index
    %35 = vector.load %arg10[%c0_14, %c0_15, %c0_16] : memref<10x10x4xbf16, #tpu.memory_space<vmem>>, vector<10x10x4xbf16>
    %36 = arith.extf %35 : vector<10x10x4xbf16> to vector<10x10x4xf32>
    %37 = vector.extract_strided_slice %36 {offsets = [0, 0, 0], sizes = [8, 8, 4], strides = [1, 1, 1]} : vector<10x10x4xf32> to vector<8x8x4xf32>
    %38 = vector.extract_strided_slice %36 {offsets = [0, 1, 0], sizes = [8, 8, 4], strides = [1, 1, 1]} : vector<10x10x4xf32> to vector<8x8x4xf32>
    %39 = vector.extract_strided_slice %36 {offsets = [0, 2, 0], sizes = [8, 8, 4], strides = [1, 1, 1]} : vector<10x10x4xf32> to vector<8x8x4xf32>
    %40 = vector.extract_strided_slice %36 {offsets = [1, 0, 0], sizes = [8, 8, 4], strides = [1, 1, 1]} : vector<10x10x4xf32> to vector<8x8x4xf32>
    %41 = vector.extract_strided_slice %36 {offsets = [1, 1, 0], sizes = [8, 8, 4], strides = [1, 1, 1]} : vector<10x10x4xf32> to vector<8x8x4xf32>
    %42 = vector.extract_strided_slice %36 {offsets = [1, 2, 0], sizes = [8, 8, 4], strides = [1, 1, 1]} : vector<10x10x4xf32> to vector<8x8x4xf32>
    %43 = vector.extract_strided_slice %36 {offsets = [2, 0, 0], sizes = [8, 8, 4], strides = [1, 1, 1]} : vector<10x10x4xf32> to vector<8x8x4xf32>
    %44 = vector.extract_strided_slice %36 {offsets = [2, 1, 0], sizes = [8, 8, 4], strides = [1, 1, 1]} : vector<10x10x4xf32> to vector<8x8x4xf32>
    %45 = vector.extract_strided_slice %36 {offsets = [2, 2, 0], sizes = [8, 8, 4], strides = [1, 1, 1]} : vector<10x10x4xf32> to vector<8x8x4xf32>
    %46 = tpu.concatenate %37, %38, %39, %40, %41, %42, %43, %44, %45 in 2 : vector<8x8x4xf32>, vector<8x8x4xf32>, vector<8x8x4xf32>, vector<8x8x4xf32>, vector<8x8x4xf32>, vector<8x8x4xf32>, vector<8x8x4xf32>, vector<8x8x4xf32>, vector<8x8x4xf32> -> vector<8x8x36xf32>
    %47 = vector.shape_cast %46 : vector<8x8x36xf32> to vector<64x36xf32>
    %48 = arith.truncf %47 : vector<64x36xf32> to vector<64x36xbf16>
    %c0_17 = arith.constant 0 : index
    %c0_18 = arith.constant 0 : index
    %49 = vector.load %arg4[%c0_17, %c0_18] : memref<36x4xbf16, #tpu.memory_space<vmem>>, vector<36x4xbf16>
    %cst_19 = arith.constant dense<0.000000e+00> : vector<64x4xf32>
    %50 = tpu.matmul %48, %49, %cst_19 {dimension_numbers = #tpu.dot_dimension_numbers<[1], [0], [0], [1], [0, 0, 1, 1], [], []>} : vector<64x36xbf16>, vector<36x4xbf16>, vector<64x4xf32> -> vector<64x4xf32>
    %c0_20 = arith.constant 0 : index
    %c0_21 = arith.constant 0 : index
    %51 = vector.load %arg5[%c0_20, %c0_21] : memref<1x4xf32, #tpu.memory_space<vmem>>, vector<1x4xf32>
    %52 = vector.broadcast %51 : vector<1x4xf32> to vector<64x4xf32>
    %53 = arith.addf %50, %52 : vector<64x4xf32>
    %c0_22 = arith.constant 0 : index
    %c0_23 = arith.constant 0 : index
    %c0_24 = arith.constant 0 : index
    %c0_25 = arith.constant 0 : index
    %54 = vector.load %arg6[%c0_22, %c0_23, %c0_24, %c0_25] : memref<1x8x8x4xbf16, #tpu.memory_space<vmem>>, vector<1x8x8x4xbf16>
    %55 = vector.shape_cast %54 : vector<1x8x8x4xbf16> to vector<8x8x4xbf16>
    %56 = vector.shape_cast %55 : vector<8x8x4xbf16> to vector<64x4xbf16>
    %c0_26 = arith.constant 0 : index
    %c0_27 = arith.constant 0 : index
    %57 = vector.load %arg7[%c0_26, %c0_27] : memref<4x4xbf16, #tpu.memory_space<vmem>>, vector<4x4xbf16>
    %cst_28 = arith.constant dense<0.000000e+00> : vector<64x4xf32>
    %58 = tpu.matmul %56, %57, %cst_28 {dimension_numbers = #tpu.dot_dimension_numbers<[1], [0], [0], [1], [0, 0, 1, 1], [], []>} : vector<64x4xbf16>, vector<4x4xbf16>, vector<64x4xf32> -> vector<64x4xf32>
    %c0_29 = arith.constant 0 : index
    %c0_30 = arith.constant 0 : index
    %59 = vector.load %arg8[%c0_29, %c0_30] : memref<1x4xf32, #tpu.memory_space<vmem>>, vector<1x4xf32>
    %60 = vector.broadcast %59 : vector<1x4xf32> to vector<64x4xf32>
    %61 = arith.addf %58, %60 : vector<64x4xf32>
    %62 = arith.addf %53, %61 : vector<64x4xf32>
    %cst_31 = arith.constant 0.000000e+00 : f32
    %63 = vector.broadcast %cst_31 : f32 to vector<64x4xf32>
    %64 = arith.maximumf %62, %63 : vector<64x4xf32>
    %65 = vector.shape_cast %64 : vector<64x4xf32> to vector<8x8x4xf32>
    %66 = vector.shape_cast %65 : vector<8x8x4xf32> to vector<1x8x8x4xf32>
    %67 = arith.truncf %66 : vector<1x8x8x4xf32> to vector<1x8x8x4xbf16>
    %c0_32 = arith.constant 0 : index
    %c0_33 = arith.constant 0 : index
    %c0_34 = arith.constant 0 : index
    %c0_35 = arith.constant 0 : index
    %68 = vector.load %arg9[%c0_32, %c0_33, %c0_34, %c0_35] : memref<1x8x8x4xbf16, #tpu.memory_space<vmem>>, vector<1x8x8x4xbf16>
    tpu.vector_store %arg9[%c0_32, %c0_33, %c0_34, %c0_35], %67 {strides = array<i32>} : memref<1x8x8x4xbf16, #tpu.memory_space<vmem>>, vector<1x8x8x4xbf16>,
    return
  }
  func.func @transform_0(%arg0: i32) -> (i32, i32, i32, i32) {
    %c0_i32 = arith.constant 0 : i32
    %c0_i32_0 = arith.constant 0 : i32
    %c0_i32_1 = arith.constant 0 : i32
    %c0_i32_2 = arith.constant 0 : i32
    return %arg0, %c0_i32, %c0_i32_0, %c0_i32_1 : i32, i32, i32, i32
  }
  func.func @transform_1(%arg0: i32) -> (i32, i32) {
    %c0_i32 = arith.constant 0 : i32
    %c0_i32_0 = arith.constant 0 : i32
    %c0_i32_1 = arith.constant 0 : i32
    return %c0_i32, %c0_i32_0 : i32, i32
  }
  func.func @transform_2(%arg0: i32) -> (i32, i32) {
    %c0_i32 = arith.constant 0 : i32
    %c0_i32_0 = arith.constant 0 : i32
    %c0_i32_1 = arith.constant 0 : i32
    return %c0_i32, %c0_i32_0 : i32, i32
  }
  func.func @transform_3(%arg0: i32) -> (i32, i32) {
    %c0_i32 = arith.constant 0 : i32
    %c0_i32_0 = arith.constant 0 : i32
    %c0_i32_1 = arith.constant 0 : i32
    return %c0_i32, %c0_i32_0 : i32, i32
  }
  func.func @transform_4(%arg0: i32) -> (i32, i32) {
    %c0_i32 = arith.constant 0 : i32
    %c0_i32_0 = arith.constant 0 : i32
    %c0_i32_1 = arith.constant 0 : i32
    return %c0_i32, %c0_i32_0 : i32, i32
  }
  func.func @transform_5(%arg0: i32) -> (i32, i32, i32, i32) {
    %c0_i32 = arith.constant 0 : i32
    %c0_i32_0 = arith.constant 0 : i32
    %c0_i32_1 = arith.constant 0 : i32
    %c0_i32_2 = arith.constant 0 : i32
    return %arg0, %c0_i32, %c0_i32_0, %c0_i32_1 : i32, i32, i32, i32
  }
  func.func @transform_6(%arg0: i32) -> (i32, i32) {
    %c0_i32 = arith.constant 0 : i32
    %c0_i32_0 = arith.constant 0 : i32
    %c0_i32_1 = arith.constant 0 : i32
    return %c0_i32, %c0_i32_0 : i32, i32
  }
  func.func @transform_7(%arg0: i32) -> (i32, i32) {
    %c0_i32 = arith.constant 0 : i32
    %c0_i32_0 = arith.constant 0 : i32
    %c0_i32_1 = arith.constant 0 : i32
    return %c0_i32, %c0_i32_0 : i32, i32
  }
  func.func @transform_8(%arg0: i32) -> (i32, i32, i32, i32) {
    %c0_i32 = arith.constant 0 : i32
    %c0_i32_0 = arith.constant 0 : i32
    %c0_i32_1 = arith.constant 0 : i32
    %c0_i32_2 = arith.constant 0 : i32
    return %arg0, %c0_i32, %c0_i32_0, %c0_i32_1 : i32, i32, i32, i32
  }
}

</mosaic_0001>

<bundles_post_ra>
// kernel: tpu_custom_call.1
= control target key start
LH: loop header
LB: loop body
LE: loop exit
PB: predicated region body
PF: predicated region fallthrough
CT: control target
= control target key end

     0   :  { %s2371_s27 = smov 0   ;;  %s3072_s0 = inlined_call_operand.vmem [shape: bf16[8,9,9,4], index: 0, kind: input, shape index: {}]   ;;  %s3073_s1 = inlined_call_operand.vmem [shape: bf16[36,4], index: 1, kind: input, shape index: {}]   ;;  %s3074_s2 = inlined_call_operand.vmem [shape: f32[1,4], index: 2, kind: input, shape index: {}]   ;;  %s3075_s3 = inlined_call_operand.vmem [shape: bf16[36,4], index: 3, kind: input, shape index: {}]   ;;  %s3076_s4 = inlined_call_operand.vmem [shape: f32[1,4], index: 4, kind: input, shape index: {}]   ;;  %s3077_s5 = inlined_call_operand.vmem [shape: bf16[2,8,8,4], index: 5, kind: input, shape index: {}]   ;;  %s3078_s6 = inlined_call_operand.vmem [shape: bf16[4,4], index: 6, kind: input, shape index: {}]   ;;  %s3079_s7 = inlined_call_operand.vmem [shape: f32[1,4], index: 7, kind: input, shape index: {}]   ;;  %s3080_s8 = inlined_call_operand.vmem [shape: bf16[2,8,8,4], index: 8, kind: output, shape index: {}]  }
   0x1 LB: > { %s2377_s28 = sadd.s32 4294967295, %s2315_s27   ;;  %p1818_p0 = scmp.ge.s32.totalorder %s2315_s27, 1  ;;  %s2315_s27 = sphi %s2371_s27, %s18_s27  }
   0x2   : > { %p274_p1 = scmp.lt.s32.totalorder %s2315_s27, 3 }
   0x4   : > { %p275_p2 = pnand %p1818_p0, %p274_p1 }
   0x5   : > { %s1819_s29 = sshll.u32 (!%p275_p2), %s2377_s28, 2  ;;  %vm482_vm0 = vcmask (!%p275_p2), 1046528   ;;  %s2317_s12 = smov (!%p275_p2), 12   ;;  %vm845_vm1 = vcmask (!%p275_p2), 1041408   ;;  %vm729_vm2 = vcmask (!%p275_p2), 31744   ;;  %vm738_vm3 = vcmask (!%p275_p2), 64512  }
   0x6   : > { %278 = sbr.rel (%p275_p2) target bundleno = 847 (0x34f), region = 52  ;;  %p315_p3 = scmp.lt.s32.totalorder (!%p275_p2), %s1819_s29, 7  ;;  %vm747_vm4 = vcmask (!%p275_p2), 97280   ;;  %vm756_vm5 = vcmask (!%p275_p2), 130048   ;;  %vm765_vm6 = vcmask (!%p275_p2), 162816   ;;  %vm774_vm7 = vcmask (!%p275_p2), 195584  }
   0x7   : > { %s2318_s13 = smov (!%p275_p2), 4   ;;  %s2319_s14 = smov (!%p275_p2), 16   ;;  %vm783_vm8 = vcmask (!%p275_p2), 228352   ;;  %vm792_vm9 = vcmask (!%p275_p2), 261120   ;;  %vm3081_vm10 = vcmask (!%p275_p2), 293888   ;;  %vm922_vm11 = vcmask (!%p275_p2), 27648  }
   0x8   : > { %s2320_s15 = smov (!%p275_p2), 8   ;;  %s2321_s20 = smov (!%p275_p2), 20   ;;  %vm924_vm12 = vcmask (!%p275_p2), 24576   ;;  %vm1058_vm13 = vsmask.f32 (!%p275_p2), 7938 }
   0x9   : > { %s2322_s21 = smov (!%p275_p2), 24   ;;  %s2323_s22 = smov (!%p275_p2), 28   ;;  %vm1064_vm14 = vsmask.f32 (!%p275_p2), 256  ;;  %vm2694_vm15 = vmand (!%p275_p2), %vm922_vm11, %vm1058_vm13 }
   0xa   : > { %s2324_s25 = smov (!%p275_p2), 32   ;;  %p321_p4 = scmp.lt.s32.totalorder (!%p275_p2), %s2377_s28, 1 }
   0xd   : > { %s3091_s29 = smov (!%p315_p3, %s1819_s29), 7  ;;  %s3093_s28 = smov (!%p321_p4, %s2377_s28), 1 }
   0xe   : > { %s1961_s30 = smul.u32 72, %s3091_s29  ;;  %s1860_s16 = sshll.u32 %s3093_s28, 5 }
   0xf   : > { %s2886_s19 = scalar_lea.vmem %s3077_s5, %s1860_s16  ;;  %s330_s26 = scalar_lea.vmem %s3080_s8, %s1860_s16 }
  0x10   : > { %s2385_s11 = scalar_lea.vmem %s3072_s0, %s1961_s30 }
  0x11   : > { %v2388_v0 = vld [vmem:[%s2385_s11 + $0xa0] ss:$8 sps:$4 sm:$0xff]   ;;  %v359_v8 = vld [vmem:[%s2385_s11 + $0x90] ss:$8 sps:$4 sm:$0xff]   ;;  %v333_v14 = vld [vmem:[%s2385_s11 + $0x4] sm:$0x1] }
  0x12   : > { %v2391_v1 = vld [vmem:[%s2385_s11 + $0x48] ss:$8 sps:$4 sm:$0xff]   ;;  %v414_v3 = vunpack.c.l.bf16 %v2388_v0  ;;  %v416_v4 = vunpack.c.h.bf16 %v2388_v0  ;;  %v2399_v7 = vld [vmem:[%s2385_s11 + $0x58] ss:$8 sps:$4 sm:$0xff]   ;;  %v335_v15 = vld [vmem:[%s2385_s11 + $0xc] sm:$0x1]  ;;  %v410_v21 = vunpack.c.l.bf16 %v359_v8  ;;  %v412_v22 = vunpack.c.h.bf16 %v359_v8 }
  0x13   : > { %v377_v2 = vld [vmem:[%s2385_s11 + $0xe8] ss:$8 sps:$4 sm:$0xff]   ;;  %v401_v5 = vunpack.c.l.bf16 %v2391_v1  ;;  %v402_v6 = vunpack.c.h.bf16 %v2391_v1  ;;  %v403_v11 = vunpack.c.l.bf16 %v2399_v7  ;;  %v404_v12 = vunpack.c.h.bf16 %v2399_v7  ;;  %v375_v18 = vld [vmem:[%s2385_s11 + $0xd8] ss:$8 sps:$4 sm:$0xff]   ;;  %v337_v28 = vld [vmem:[%s2385_s11 + $0x14] sm:$0x1] }
  0x14   : > { %v428_v9 = vunpack.c.l.bf16 %v377_v2  ;;  %v429_v10 = vunpack.c.h.bf16 %v377_v2  ;;  %v2405_v13 = vld [vmem:[%s2385_s11] ss:$8 sps:$4 sm:$0xff]   ;;  %v1994_v16 = vpack.i.bf16 %v416_v4, %v414_v3  ;;  %v384_v24 = vunpack.c.l.bf16 %v333_v14  ;;  %v336_v27 = vld [vmem:[%s2385_s11 + $0x10] ss:$8 sps:$4 sm:$0xff]   ;;  %v339_v33 = vld [vmem:[%s2385_s11 + $0x1c] sm:$0x1] }
  0x15   : > { %v1979_v17 = vpack.i.bf16 %v402_v6, %v401_v5  ;;  %v1984_v20 = vpack.i.bf16 %v404_v12, %v403_v11  ;;  %v383_v23 = vunpack.c.l.bf16 %v2405_v13  ;;  %v2420_v25 = vunpack.c.h.bf16 %v2405_v13  ;;  %v360_v34 = vld [vmem:[%s2385_s11 + $0x94] sm:$0x1]  ;;  %v362_v43 = vld [vmem:[%s2385_s11 + $0x9c] sm:$0x1]  ;;  %v364_v48 = vld [vmem:[%s2385_s11 + $0xa4] sm:$0x1] }
  0x16   : > { %v2004_v19 = vpack.i.bf16 %v429_v10, %v428_v9  ;;  %1995 = vrot.lane.b32.xlu1 %v1994_v16, %s2317_s12  ;;  %v386_v26 = vunpack.c.l.bf16 %v335_v15  ;;  %v612_v29 = vrot.slane %v416_v4, 1  ;;  %v606_v30 = vrot.slane %v412_v22, 1  ;;  %v366_v49 = vld [vmem:[%s2385_s11 + $0xac] sm:$0x1]  ;;  %v340_v8 = vld [vmem:[%s2385_s11 + $0x20] ss:$72 sps:$4 sm:$0xff]  }
  0x17   : > { %1980 = vrot.lane.b32.xlu0 %v1979_v17, %s2318_s13  ;;  %v1989_v31 = vpack.i.bf16 %v412_v22, %v410_v21  ;;  %v426_v32 = vunpack.c.l.bf16 %v375_v18  ;;  %v483_v35 = vrot.slane %v383_v23, 1  ;;  %v484_v36 = vrot.slane %v384_v24, 1  ;;  %v2299_v15 = vld [vmem:[%s3073_s1] sm:$0xff]  }
  0x18   : > { %v486_v37 = vrot.slane %v2420_v25, 1  ;;  %v487_v38 = vrot.slane %v386_v26, 1  ;;  %v427_v39 = vunpack.c.h.bf16 %v375_v18  ;;  %v2429_v40 = vunpack.c.l.bf16 %v336_v27  ;;  %1889 = vmatprep.subr.bf16.mxu0 %v2299_v15  ;;  %v2478_v26 = vld [vmem:[%s2385_s11 + $0x70] ss:$8 sps:$4 sm:$0xff]  }
  0x19   : > { %v388_v41 = vunpack.c.l.bf16 %v337_v28  ;;  %v2431_v42 = vunpack.c.h.bf16 %v336_v27  ;;  %v485_v44 = vsel %vm482_vm0, %v483_v35, %v484_v36  ;;  %v390_v46 = vunpack.c.l.bf16 %v339_v33  ;;  %1890 = vmatpush3.bf16.msra.mxu0 %v2299_v15  ;;  %v2481_v28 = vld [vmem:[%s2385_s11 + $0x28] ss:$88 sps:$4 sm:$0xff]  }
  0x1a   : > { %2005 = vrot.lane.b32.xlu1 %v2004_v19, %s2319_s14  ;;  %v2438_v45 = vsel %vm482_vm0, %v486_v37, %v487_v38  ;;  %v411_v47 = vunpack.c.l.bf16 %v360_v34  ;;  %v603_v50 = vrot.slane %v410_v21, 1  ;;  %v489_v52 = vrot.slane %v2429_v40, 1  ;;  %v341_v19 = vld [vmem:[%s2385_s11 + $0x24] sm:$0x1]  ;;  %v2300_v21 = vld [vmem:[%s3073_s1 + $0x8] sm:$0xff]  }
  0x1b   : > { %1985 = vrot.lane.b32.xlu0 %v1984_v20, %s2318_s13  ;;  %v2009_v51 = vpack.i.bf16 %v2438_v45, %v485_v44  ;;  %v490_v53 = vrot.slane %v388_v41, 1  ;;  %v492_v54 = vrot.slane %v2431_v42, 1  ;;  %v493_v55 = vrot.slane %v390_v46, 1  ;;  %1891 = vmatprep.subr.bf16.mxu0 %v2300_v21 }
  0x1c   : > { %v413_v56 = vunpack.c.l.bf16 %v362_v43  ;;  %v604_v57 = vrot.slane %v411_v47, 1  ;;  %v609_v58 = vrot.slane %v414_v3, 1  ;;  %v415_v60 = vunpack.c.l.bf16 %v364_v48 }
  0x1d   : > { %v2446_v59 = vsel %vm482_vm0, %v489_v52, %v490_v53  ;;  %v417_v61 = vunpack.c.l.bf16 %v366_v49  ;;  %v1999_v62 = vpack.i.bf16 %v427_v39, %v426_v32  ;;  %v2451_v63 = vsel %vm482_vm0, %v492_v54, %v493_v55  ;;  %v347_v32 = vld [vmem:[%s2385_s11 + $0x3c] sm:$0x1]  ;;  %1892 = vmatpush3.bf16.msra.mxu0 %v2300_v21  ;;  %v367_v52 = vld [vmem:[%s2385_s11 + $0xb0] ss:$8 sps:$4 sm:$0xff]  }
  0x1e   : > { %2010 = vrot.lane.b32.xlu1 %v2009_v51, %s2320_s15  ;;  %v607_v0 = vrot.slane %v413_v56, 1  ;;  %v2014_v2 = vpack.i.bf16 %v2451_v63, %v2446_v59  ;;  %v605_v3 = vsel %vm482_vm0, %v603_v50, %v604_v57  ;;  %v610_v4 = vrot.slane %v415_v60, 1  ;;  %v2301_v53 = vld [vmem:[%s3073_s1 + $0x10] ss:$0 sps:$4 sm:$0x33]  }
  0x1f   : > { %1990 = vrot.lane.b32.xlu0 %v1989_v31, %s2317_s12  ;;  %v613_v5 = vrot.slane %v417_v61, 1  ;;  %v2465_v18 = vunpack.c.l.bf16 %v340_v8  ;;  %v405_v20 = vunpack.c.h.bf16 %v340_v8  ;;  %v2029_v22 = vpack.i.bf16 %v2429_v40, %v2420_v25  ;;  %v345_v31 = vld [vmem:[%s2385_s11 + $0x34] sm:$0x1]  ;;  %v371_v56 = vld [vmem:[%s2385_s11 + $0xc0] ss:$8 sps:$4 sm:$0xff]   ;;  %1957 = vmatprep.subr.msk.bf16.mxu0 %vm845_vm1, %v2301_v53 }
  0x20   : > { %v608_v9 = vsel %vm482_vm0, %v606_v30, %v607_v0  ;;  %v611_v10 = vsel %vm482_vm0, %v609_v58, %v610_v4  ;;  %v392_v27 = vunpack.c.l.bf16 %v341_v19  ;;  %v344_v30 = vld [vmem:[%s2385_s11 + $0x30] ss:$8 sps:$4 sm:$0xff]   ;;  %v2039_v33 = vpack.i.bf16 %v403_v11, %v402_v6  ;;  %v368_v60 = vld [vmem:[%s2385_s11 + $0xb4] sm:$0x1]  ;;  %v370_v61 = vld [vmem:[%s2385_s11 + $0xbc] sm:$0x1] }
  0x21   : > { %v614_v14 = vsel %vm482_vm0, %v612_v29, %v613_v5  ;;  %v2019_v16 = vpack.i.bf16 %v608_v9, %v605_v3  ;;  %v2034_v24 = vpack.i.bf16 %v2465_v18, %v2431_v42  ;;  %v343_v29 = vld [vmem:[%s2385_s11 + $0x2c] sm:$0x1]  ;;  %v2044_v34 = vpack.i.bf16 %v405_v20, %v404_v12 }
  0x22   : > { %2015 = vrot.lane.b32.xlu1 %v2014_v2, %s2320_s15  ;;  %v2024_v17 = vpack.i.bf16 %v614_v14, %v611_v10  ;;  %v406_v35 = vunpack.c.l.bf16 %v2478_v26  ;;  %v495_v36 = vrot.slane %v2465_v18, 1  ;;  %v496_v37 = vrot.slane %v392_v27, 1  ;;  %v374_v0 = vld [vmem:[%s2385_s11 + $0xcc] sm:$0x1]  ;;  %v379_v10 = vld [vmem:[%s2385_s11 + $0xf8] ss:$8 sps:$4 sm:$0xff]  }
  0x23   : > { %2000 = vrot.lane.b32.xlu0 %v1999_v62, %s2319_s14  ;;  %v2498_v38 = vunpack.c.l.bf16 %v2481_v28  ;;  %v394_v1 = vunpack.c.l.bf16 %v343_v29  ;;  %v2500_v39 = vunpack.c.l.bf16 %v344_v30  ;;  %v396_v6 = vunpack.c.l.bf16 %v345_v31  ;;  %v381_v14 = vld [vmem:[%s2385_s11 + $0x108] ss:$8 sps:$4 sm:$0xff]  }
  0x24   : > { %v2502_v11 = vunpack.c.h.bf16 %v344_v30  ;;  %v398_v7 = vunpack.c.l.bf16 %v347_v32  ;;  %v2049_v12 = vpack.i.bf16 %v2446_v59, %v2438_v45  ;;  %v2054_v41 = vpack.i.bf16 %v406_v35, %v405_v20 }
  0x25   : > { %v407_v43 = vunpack.c.h.bf16 %v2478_v26  ;;  %v497_v44 = vsel %vm482_vm0, %v495_v36, %v496_v37  ;;  %v408_v46 = vunpack.c.h.bf16 %v2481_v28  ;;  %v498_v47 = vrot.slane %v2498_v38, 1 }
  0x26   : > { %2025 = vrot.lane.b32.xlu1 %v2024_v17, %s2321_s20  ;;  %v499_v48 = vrot.slane %v394_v1, 1  ;;  %v501_v45 = vrot.slane %v2500_v39, 1  ;;  %v502_v49 = vrot.slane %v396_v6, 1  ;;  %v504_v50 = vrot.slane %v2502_v11, 1 }
  0x27   : > { %2020 = vrot.lane.b32.xlu0 %v2019_v16, %s2321_s20  ;;  %v505_v51 = vrot.slane %v398_v7, 1  ;;  %v2059_v54 = vpack.i.bf16 %v497_v44, %v2451_v63  ;;  %v2064_v55 = vpack.i.bf16 %v408_v46, %v407_v43  ;;  %v418_v62 = vunpack.c.l.bf16 %v367_v52  ;;  %v372_v63 = vld [vmem:[%s2385_s11 + $0xc4] sm:$0x1] }
  0x28   : > { %v2529_v57 = vsel %vm482_vm0, %v498_v47, %v499_v48  ;;  %v2532_v58 = vsel %vm482_vm0, %v501_v45, %v502_v49  ;;  %v420_v2 = vunpack.c.h.bf16 %v367_v52  ;;  %v422_v3 = vunpack.c.l.bf16 %v371_v56  ;;  %v348_v48 = vld [vmem:[%s2385_s11 + $0x40] ss:$72 sps:$4 sm:$0xff]   ;;  %v349_v45 = vld [vmem:[%s2385_s11 + $0x44] sm:$0x1] }
  0x29   : > { %v2535_v59 = vsel %vm482_vm0, %v504_v50, %v505_v51  ;;  %v424_v4 = vunpack.c.h.bf16 %v371_v56  ;;  %v847_v5 = vsel %vm845_vm1, %v2301_v53, 0  ;;  %v2069_v8 = vpack.i.bf16 %v2529_v57, %v497_v44 }
  0x2a   : > { %2035 = vrot.lane.b32.xlu1 %v2034_v24, %s2322_s21  ;;  %v2074_v9 = vpack.i.bf16 %v2535_v59, %v2532_v58  ;;  %v419_v15 = vunpack.c.l.bf16 %v368_v60  ;;  %v421_v16 = vunpack.c.l.bf16 %v370_v61  ;;  %v423_v17 = vunpack.c.l.bf16 %v372_v63  ;;  %1894 = vmatpush3.bf16.msra.mxu0 %v847_v5 }
  0x2b   : > { %2030 = vrot.lane.b32.xlu0 %v2029_v22, %s2322_s21  ;;  %v425_v19 = vunpack.c.l.bf16 %v374_v0  ;;  %v618_v20 = vrot.slane %v420_v2, 1  ;;  %v615_v21 = vrot.slane %v418_v62, 1  ;;  %v2079_v22 = vpack.i.bf16 %v420_v2, %v418_v62 }
  0x2c   : > { %v624_v24 = vrot.slane %v424_v4, 1  ;;  %v2084_v27 = vpack.i.bf16 %v424_v4, %v422_v3  ;;  %v621_v29 = vrot.slane %v422_v3, 1  ;;  %v430_v30 = vunpack.c.l.bf16 %v379_v10 }
  0x2d   : > { %v431_v31 = vunpack.c.h.bf16 %v379_v10  ;;  %v432_v32 = vunpack.c.l.bf16 %v381_v14  ;;  %v619_v36 = vrot.slane %v421_v16, 1  ;;  %v622_v37 = vrot.slane %v423_v17, 1 }
  0x2e   : > { %2045 = vrot.lane.b32.xlu1 %v2044_v34, %s2323_s22  ;;  %v616_v34 = vrot.slane %v419_v15, 1  ;;  %v625_v1 = vrot.slane %v425_v19, 1  ;;  %v399_v51 = vunpack.c.l.bf16 %v348_v48  ;;  %v400_v52 = vunpack.c.l.bf16 %v349_v45 }
  0x2f   : > { %2040 = vrot.lane.b32.xlu0 %v2039_v33, %s2323_s22  ;;  %v433_v33 = vunpack.c.h.bf16 %v381_v14  ;;  %v2089_v6 = vpack.i.bf16 %v431_v31, %v430_v30  ;;  %v623_v44 = vsel %vm482_vm0, %v621_v29, %v622_v37  ;;  %v2109_v53 = vpack.i.bf16 %v2500_v39, %v2498_v38 }
  0x30   : > { %v626_v47 = vsel %vm482_vm0, %v624_v24, %v625_v1  ;;  %v702_v56 = vrot.slane %v399_v51, 1  ;;  %v703_v60 = vrot.slane %v400_v52, 1  ;;  %v2119_v61 = vpack.i.bf16 %v407_v43, %v406_v35 }
  0x31   : > { %v2094_v7 = vpack.i.bf16 %v433_v33, %v432_v32  ;;  %v2104_v50 = vpack.i.bf16 %v626_v47, %v623_v44  ;;  %v2129_v0 = vpack.i.bf16 %v2532_v58, %v2529_v57 }
  0x32   : > { %2055 = vrot.lane.b32.xlu1 %v2054_v41, %s2318_s13  ;;  %v620_v41 = vsel %vm482_vm0, %v618_v20, %v619_v36  ;;  %v704_v63 = vsel %vm482_vm0, %v702_v56, %v703_v60 }
  0x33   : > { %2050 = vrot.lane.b32.xlu0 %v2049_v12, %s2324_s25  ;;  %v617_v12 = vsel %vm482_vm0, %v615_v21, %v616_v34  ;;  %v2134_v2 = vpack.i.bf16 %v704_v63, %v2535_v59 }
  0x34   : > { %v2099_v49 = vpack.i.bf16 %v620_v41, %v617_v12 }
  0x36   : > { %2065 = vrot.lane.b32.xlu1 %v2064_v55, %s2318_s13  ;;  %v409_v55 = vunpack.c.h.bf16 %v348_v48 }
  0x37   : > { %2060 = vrot.lane.b32.xlu0 %v2059_v54, %s2324_s25  ;;  %v2114_v54 = vpack.i.bf16 %v399_v51, %v2502_v11 }
  0x38   : > { %v2124_v62 = vpack.i.bf16 %v409_v55, %v408_v46 }
  0x3a   : > { %2075 = vrot.lane.b32.xlu1 %v2074_v9, %s2320_s15 }
  0x3b   : > { %2070 = vrot.lane.b32.xlu0 %v2069_v8, %s2320_s15 }
  0x3e   : > { %2085 = vrot.lane.b32.xlu1 %v2084_v27, %s2317_s12 }
  0x3f   : > { %2080 = vrot.lane.b32.xlu0 %v2079_v22, %s2317_s12 }
  0x42   : > { %2095 = vrot.lane.b32.xlu1 %v2094_v7, %s2319_s14 }
  0x43   : > { %2090 = vrot.lane.b32.xlu0 %v2089_v6, %s2319_s14 }
  0x46   : > { %2105 = vrot.lane.b32.xlu1 %v2104_v50, %s2321_s20 }
  0x47   : > { %2100 = vrot.lane.b32.xlu0 %v2099_v49, %s2321_s20 }
  0x4a   : > { %2115 = vrot.lane.b32.xlu1 %v2114_v54, %s2322_s21 }
  0x4b   : > { %2110 = vrot.lane.b32.xlu0 %v2109_v53, %s2322_s21 }
  0x4e   : > { %2125 = vrot.lane.b32.xlu1 %v2124_v62, %s2323_s22 }
  0x4f   : > { %2120 = vrot.lane.b32.xlu0 %v2119_v61, %s2323_s22 }
  0x52   : > { %2135 = vrot.lane.b32.xlu1 %v2134_v2, %s2324_s25 }
  0x53   : > { %2130 = vrot.lane.b32.xlu0 %v2129_v0, %s2324_s25 }
  0x88   : > { %v1996_v26 = vpop.permute.xlu1 %1995 }
  0x89   : > { %v1981_v35 = vpop.permute.xlu0 %1980  ;;  %v1998_v19 = vunpack.i.h.bf16 %v1996_v26  ;;  %v1997_v20 = vunpack.i.l.bf16 %v1996_v26 }
  0x8a   : > { %v1983_v8 = vunpack.i.h.bf16 %v1981_v35  ;;  %v1982_v9 = vunpack.i.l.bf16 %v1981_v35 }
  0x8c   : > { %v2006_v43 = vpop.permute.xlu1 %2005  ;;  %v730_v21 = vsel %vm729_vm2, %v383_v23, %v1982_v9  ;;  %v731_v22 = vsel %vm729_vm2, %v2420_v25, %v1983_v8 }
  0x8d   : > { %v1986_v28 = vpop.permute.xlu0 %1985  ;;  %v2008_v37 = vunpack.i.h.bf16 %v2006_v43  ;;  %v2007_v1 = vunpack.i.l.bf16 %v2006_v43 }
  0x8e   : > { %v1988_v10 = vunpack.i.h.bf16 %v1986_v28  ;;  %v1987_v14 = vunpack.i.l.bf16 %v1986_v28 }
  0x90   : > { %v2011_v3 = vpop.permute.xlu1 %2010  ;;  %v732_v24 = vsel %vm729_vm2, %v2429_v40, %v1987_v14  ;;  %v733_v27 = vsel %vm729_vm2, %v2431_v42, %v1988_v10 }
  0x91   : > { %v1991_v46 = vpop.permute.xlu0 %1990  ;;  %v2013_v16 = vunpack.i.h.bf16 %v2011_v3  ;;  %v2012_v17 = vunpack.i.l.bf16 %v2011_v3 }
  0x92   : > { %v1993_v31 = vunpack.i.h.bf16 %v1991_v46  ;;  %v1992_v32 = vunpack.i.l.bf16 %v1991_v46 }
  0x93   : > { %v740_v13 = vsel %vm738_vm3, %v731_v22, %v2013_v16  ;;  %v739_v23 = vsel %vm738_vm3, %v730_v21, %v2012_v17 }
  0x94   : > { %v2016_v5 = vpop.permute.xlu1 %2015  ;;  %v748_v44 = vsel %vm747_vm4, %v739_v23, %v1992_v32  ;;  %v749_v47 = vsel %vm747_vm4, %v740_v13, %v1993_v31 }
  0x95   : > { %v2001_v4 = vpop.permute.xlu0 %2000  ;;  %v2018_v58 = vunpack.i.h.bf16 %v2016_v5  ;;  %v2017_v59 = vunpack.i.l.bf16 %v2016_v5 }
  0x96   : > { %v2003_v36 = vunpack.i.h.bf16 %v2001_v4  ;;  %v2002_v25 = vunpack.i.l.bf16 %v2001_v4 }
  0x97   : > { %v742_v33 = vsel %vm738_vm3, %v733_v27, %v2018_v58  ;;  %v741_v34 = vsel %vm738_vm3, %v732_v24, %v2017_v59 }
  0x98   : > { %v2583_v57 = vpop.permute.xlu1 %2025  ;;  %v751_v40 = vsel %vm747_vm4, %v742_v33, %v1998_v19  ;;  %v750_v42 = vsel %vm747_vm4, %v741_v34, %v1997_v20  ;;  %v757_v49 = vsel %vm756_vm5, %v748_v44, %v2002_v25  ;;  %v758_v50 = vsel %vm756_vm5, %v749_v47, %v2003_v36 }
  0x99   : > { %v2021_v15 = vpop.permute.xlu0 %2020  ;;  %v2028_v53 = vunpack.i.h.bf16 %v2583_v57  ;;  %v2027_v54 = vunpack.i.l.bf16 %v2583_v57  ;;  %v759_v55 = vsel %vm756_vm5, %v750_v42, %v2007_v1  ;;  %v760_v56 = vsel %vm756_vm5, %v751_v40, %v2008_v37 }
  0x9a   : > { %v2023_v6 = vunpack.i.h.bf16 %v2021_v15  ;;  %v2022_v7 = vunpack.i.l.bf16 %v2021_v15 }
  0x9b   : > { %v768_v10 = vsel %vm765_vm6, %v759_v55, %v2027_v54  ;;  %v769_v14 = vsel %vm765_vm6, %v760_v56, %v2028_v53 }
  0x9c   : > { %v2036_v30 = vpop.permute.xlu1 %2035  ;;  %v766_v60 = vsel %vm765_vm6, %v757_v49, %v2022_v7  ;;  %v767_v61 = vsel %vm765_vm6, %v758_v50, %v2023_v6 }
  0x9d   : > { %v2031_v29 = vpop.permute.xlu0 %2030  ;;  %v2038_v62 = vunpack.i.h.bf16 %v2036_v30  ;;  %v2037_v63 = vunpack.i.l.bf16 %v2036_v30 }
  0x9e   : > { %v2033_v48 = vunpack.i.h.bf16 %v2031_v29  ;;  %v2032_v45 = vunpack.i.l.bf16 %v2031_v29 }
  0x9f   : > { %v777_v59 = vsel %vm774_vm7, %v768_v10, %v2037_v63  ;;  %v778_v16 = vsel %vm774_vm7, %v769_v14, %v2038_v62 }
  0xa0   : > { %v2046_v41 = vpop.permute.xlu1 %2045  ;;  %v775_v26 = vsel %vm774_vm7, %v766_v60, %v2032_v45  ;;  %v776_v35 = vsel %vm774_vm7, %v767_v61, %v2033_v48 }
  0xa1   : > { %v2041_v12 = vpop.permute.xlu0 %2040  ;;  %v2048_v46 = vunpack.i.h.bf16 %v2046_v41  ;;  %v2047_v3 = vunpack.i.l.bf16 %v2046_v41 }
  0xa2   : > { %v2043_v51 = vunpack.i.h.bf16 %v2041_v12  ;;  %v2042_v52 = vunpack.i.l.bf16 %v2041_v12 }
  0xa3   : > { %v786_v20 = vsel %vm783_vm8, %v777_v59, %v2047_v3  ;;  %v787_v21 = vsel %vm783_vm8, %v778_v16, %v2048_v46 }
  0xa4   : > { %v2056_v2 = vpop.permute.xlu1 %2055  ;;  %v784_v4 = vsel %vm783_vm8, %v775_v26, %v2042_v52  ;;  %v785_v5 = vsel %vm783_vm8, %v776_v35, %v2043_v51 }
  0xa5   : > { %v2051_v0 = vpop.permute.xlu0 %2050  ;;  %v2058_v13 = vunpack.i.h.bf16 %v2056_v2  ;;  %v2057_v23 = vunpack.i.l.bf16 %v2056_v2 }
  0xa6   : > { %v2053_v43 = vunpack.i.h.bf16 %v2051_v0  ;;  %v2052_v28 = vunpack.i.l.bf16 %v2051_v0 }
  0xa7   : > { %v735_v48 = vsel %vm729_vm2, %v2498_v38, %v2058_v13  ;;  %v734_v45 = vsel %vm729_vm2, %v2465_v18, %v2057_v23 }
  0xa8   : > { %v793_v8 = vsel %vm792_vm9, %v784_v4, %v2052_v28  ;;  %v794_v9 = vsel %vm792_vm9, %v785_v5, %v2053_v43  ;;  %v2066_v57 = vpop.permute.xlu1 %2065 }
  0xa9   : > { %v2061_v15 = vpop.permute.xlu0 %2060  ;;  %v801_v58 = vpack.c.bf16 %v794_v9, %v793_v8  ;;  %v2068_v36 = vunpack.i.h.bf16 %v2066_v57  ;;  %v2067_v25 = vunpack.i.l.bf16 %v2066_v57 }
  0xaa   : > { %v2063_v17 = vunpack.i.h.bf16 %v2061_v15  ;;  %v2062_v19 = vunpack.i.l.bf16 %v2061_v15 }
  0xab   : > { %1895 = vmatprep.mubr.msk.bf16.mxu0 %vm3081_vm10, %v801_v58  ;;  %v737_v49 = vsel %vm729_vm2, %v2502_v11, %v2068_v36  ;;  %v736_v50 = vsel %vm729_vm2, %v2500_v39, %v2067_v25 }
  0xac   : > { %v795_v22 = vsel %vm792_vm9, %v786_v20, %v2062_v19  ;;  %v796_v24 = vsel %vm792_vm9, %v787_v21, %v2063_v17  ;;  %v2076_v30 = vpop.permute.xlu1 %2075 }
  0xad   : > { %v802_v27 = vpack.c.bf16 %v796_v24, %v795_v22  ;;  %v2071_v29 = vpop.permute.xlu0 %2070  ;;  %v2078_v40 = vunpack.i.h.bf16 %v2076_v30  ;;  %v2077_v42 = vunpack.i.l.bf16 %v2076_v30 }
  0xae   : > { %v2073_v37 = vunpack.i.h.bf16 %v2071_v29  ;;  %v2072_v1 = vunpack.i.l.bf16 %v2071_v29 }
  0xaf   : > { %1896 = vmatmul.mubr.msk.bf16.vlgmr.msra.gmra.mrb[0].mxu0 %vm3081_vm10, %v802_v27  ;;  %v745_v53 = vsel %vm738_vm3, %v736_v50, %v2077_v42  ;;  %v746_v54 = vsel %vm738_vm3, %v737_v49, %v2078_v40 }
  0xb0   : > { %v2086_v32 = vpop.permute.xlu1 %2085  ;;  %v743_v51 = vsel %vm738_vm3, %v734_v45, %v2072_v1  ;;  %v744_v52 = vsel %vm738_vm3, %v735_v48, %v2073_v37 }
  0xb1   : > { %v2081_v31 = vpop.permute.xlu0 %2080  ;;  %v2088_v44 = vunpack.i.h.bf16 %v2086_v32  ;;  %v2087_v47 = vunpack.i.l.bf16 %v2086_v32 }
  0xb2   : > { %v2083_v12 = vunpack.i.h.bf16 %v2081_v31  ;;  %v2082_v41 = vunpack.i.l.bf16 %v2081_v31 }
  0xb3   : > { %v754_v39 = vsel %vm747_vm4, %v745_v53, %v2087_v47  ;;  %v755_v63 = vsel %vm747_vm4, %v746_v54, %v2088_v44 }
  0xb4   : > { %v2096_v34 = vpop.permute.xlu1 %2095  ;;  %v752_v62 = vsel %vm747_vm4, %v743_v51, %v2082_v41  ;;  %v753_v11 = vsel %vm747_vm4, %v744_v52, %v2083_v12  ;;  %v2325_v12 = vmov 0   ;;  %v2687_v41 = vld [vmem:[%s3074_s2] ss:$0 sm:$0xff] }
  0xb5   : > { %v2091_v33 = vpop.permute.xlu0 %2090  ;;  %v2098_v61 = vunpack.i.h.bf16 %v2096_v34  ;;  %v2097_v18 = vunpack.i.l.bf16 %v2096_v34  ;;  %930 = vst.msk [vmem:[#allocation2 + $0x18] sm:$0xf] %vm922_vm11, %v2325_v12  ;;  %923 = vst.msk [vmem:[#allocation2] sm:$0xf] %vm922_vm11, %v2325_v12 }
  0xb6   : > { %v2093_v38 = vunpack.i.h.bf16 %v2091_v33  ;;  %v2092_v60 = vunpack.i.l.bf16 %v2091_v33  ;;  %931 = vst.msk [vmem:[#allocation2 + $0x1c] sm:$0x1] %vm924_vm12, %v2325_v12  ;;  %925 = vst.msk [vmem:[#allocation2 + $0x4] sm:$0x1] %vm924_vm12, %v2325_v12 }
  0xb7   : > { %v763_v10 = vsel %vm756_vm5, %v754_v39, %v2097_v18  ;;  %v764_v14 = vsel %vm756_vm5, %v755_v63, %v2098_v61  ;;  %926 = vst.msk [vmem:[#allocation2 + $0x8] sm:$0xf] %vm922_vm11, %v2325_v12  ;;  %928 = vst.msk [vmem:[#allocation2 + $0x10] sm:$0xf] %vm922_vm11, %v2325_v12 }
  0xb8   : > { %v2106_v7 = vpop.permute.xlu1 %2105  ;;  %v761_v8 = vsel %vm756_vm5, %v752_v62, %v2092_v60  ;;  %v762_v9 = vsel %vm756_vm5, %v753_v11, %v2093_v38  ;;  %927 = vst.msk [vmem:[#allocation2 + $0xc] sm:$0x1] %vm924_vm12, %v2325_v12  ;;  %929 = vst.msk [vmem:[#allocation2 + $0x14] sm:$0x1] %vm924_vm12, %v2325_v12 }
  0xb9   : > { %v2101_v6 = vpop.permute.xlu0 %2100  ;;  %v2108_v26 = vunpack.i.h.bf16 %v2106_v7  ;;  %v2107_v35 = vunpack.i.l.bf16 %v2106_v7  ;;  %932 = vst.msk [vmem:[#allocation2 + $0x20] sm:$0xf] %vm922_vm11, %v2325_v12  ;;  %934 = vst.msk [vmem:[#allocation2 + $0x28] sm:$0xf] %vm922_vm11, %v2325_v12 }
  0xba   : > { %v2103_v0 = vunpack.i.h.bf16 %v2101_v6  ;;  %v2102_v2 = vunpack.i.l.bf16 %v2101_v6  ;;  %933 = vst.msk [vmem:[#allocation2 + $0x24] sm:$0x1] %vm924_vm12, %v2325_v12  ;;  %935 = vst.msk [vmem:[#allocation2 + $0x2c] sm:$0x1] %vm924_vm12, %v2325_v12 }
  0xbb   : > { %v772_v19 = vsel %vm765_vm6, %v763_v10, %v2107_v35  ;;  %v773_v20 = vsel %vm765_vm6, %v764_v14, %v2108_v26  ;;  %936 = vst.msk [vmem:[#allocation2 + $0x30] sm:$0xf] %vm922_vm11, %v2325_v12  ;;  %938 = vst.msk [vmem:[#allocation2 + $0x38] sm:$0xf] %vm922_vm11, %v2325_v12 }
  0xbc   : > { %v2116_v56 = vpop.permute.xlu1 %2115  ;;  %v770_v16 = vsel %vm765_vm6, %v761_v8, %v2102_v2  ;;  %v771_v17 = vsel %vm765_vm6, %v762_v9, %v2103_v0  ;;  %937 = vst.msk [vmem:[#allocation2 + $0x34] sm:$0x1] %vm924_vm12, %v2325_v12  ;;  %939 = vst.msk [vmem:[#allocation2 + $0x3c] sm:$0x1] %vm924_vm12, %v2325_v12  ;;  %v1075_v62 = vld [vmem:[#allocation2 + $0x18] sm:$0xf] }
  0xbd   : > { %v2111_v55 = vpop.permute.xlu0 %2110  ;;  %v2118_v46 = vunpack.i.h.bf16 %v2116_v56  ;;  %v2117_v3 = vunpack.i.l.bf16 %v2116_v56  ;;  %940 = vst.msk [vmem:[#allocation2 + $0x40] sm:$0xf] %vm922_vm11, %v2325_v12  ;;  %942 = vst.msk [vmem:[#allocation2 + $0x48] sm:$0xf] %vm922_vm11, %v2325_v12  ;;  %v1078_v11 = vld [vmem:[#allocation2 + $0x1c] sm:$0x1] }
  0xbe   : > { %v2113_v43 = vunpack.i.h.bf16 %v2111_v55  ;;  %v2112_v28 = vunpack.i.l.bf16 %v2111_v55  ;;  %941 = vst.msk [vmem:[#allocation2 + $0x44] sm:$0x1] %vm924_vm12, %v2325_v12  ;;  %943 = vst.msk [vmem:[#allocation2 + $0x4c] sm:$0x1] %vm924_vm12, %v2325_v12  ;;  %v1060_v35 = vld [vmem:[#allocation2 + $0x8] sm:$0xf] }
  0xbf   : > { %v781_v24 = vsel %vm774_vm7, %v772_v19, %v2117_v3  ;;  %v782_v27 = vsel %vm774_vm7, %v773_v20, %v2118_v46 }
  0xc0   : > { %v2126_v5 = vpop.permute.xlu1 %2125  ;;  %v779_v21 = vsel %vm774_vm7, %v770_v16, %v2112_v28  ;;  %v780_v22 = vsel %vm774_vm7, %v771_v17, %v2113_v43 }
  0xc1   : > { %v2121_v4 = vpop.permute.xlu0 %2120  ;;  %v2128_v58 = vunpack.i.h.bf16 %v2126_v5  ;;  %v2127_v59 = vunpack.i.l.bf16 %v2126_v5 }
  0xc2   : > { %v2123_v15 = vunpack.i.h.bf16 %v2121_v4  ;;  %v2122_v57 = vunpack.i.l.bf16 %v2121_v4  ;;  %v1066_v4 = vld [vmem:[#allocation2 + $0xc] sm:$0x1] }
  0xc3   : > { %v790_v36 = vsel %vm783_vm8, %v781_v24, %v2127_v59  ;;  %v791_v25 = vsel %vm783_vm8, %v782_v27, %v2128_v58  ;;  %v1084_v59 = vld [vmem:[#allocation2 + $0x24] sm:$0x1]  ;;  %v1069_v24 = vld [vmem:[#allocation2 + $0x10] sm:$0xf]  ;;  %v1072_v27 = vld [vmem:[#allocation2 + $0x14] sm:$0x1] }
  0xc4   : > { %v2136_v30 = vpop.permute.xlu1 %2135  ;;  %v788_v13 = vsel %vm783_vm8, %v779_v21, %v2122_v57  ;;  %v789_v23 = vsel %vm783_vm8, %v780_v22, %v2123_v15  ;;  %v1081_v15 = vld [vmem:[#allocation2 + $0x20] sm:$0xf] }
  0xc5   : > { %v2131_v29 = vpop.permute.xlu0 %2130  ;;  %v2138_v33 = vunpack.i.h.bf16 %v2136_v30  ;;  %v2137_v34 = vunpack.i.l.bf16 %v2136_v30 }
  0xc6   : > { %v2133_v31 = vunpack.i.h.bf16 %v2131_v29  ;;  %v2132_v32 = vunpack.i.l.bf16 %v2131_v29 }
  0xc7   : > { %v799_v40 = vsel %vm792_vm9, %v790_v36, %v2137_v34  ;;  %v800_v42 = vsel %vm792_vm9, %v791_v25, %v2138_v33 }
  0xc8   : > { %v797_v37 = vsel %vm792_vm9, %v788_v13, %v2132_v32  ;;  %v798_v1 = vsel %vm792_vm9, %v789_v23, %v2133_v31  ;;  %v804_v7 = vpack.c.bf16 %v800_v42, %v799_v40 }
  0xc9   : > { %v803_v6 = vpack.c.bf16 %v798_v1, %v797_v37 }
  0xcb   : > { %1899 = vmatprep.mubr.msk.bf16.mxu0 %vm3081_vm10, %v803_v6 }
  0xcc   : > { %1900 = vmatmul.mubr.msk.bf16.gmra.mrb[4].mxu0 %vm3081_vm10, %v804_v7  ;;  %vm2699_vm10 = vmand %vm924_vm12, %vm1064_vm14  ;;  %vm1215_vm12 = vcmask 1045504  }
 0x182   : > { %v1897_v44 = vpop.f32.mrb[0].mxu0 }
 0x183   : > { %v892_v47 = vadd.f32 %v1897_v44, %v2687_v41  ;;  %v883_v48 = vpop.f32.mrb[1].mxu0 }
 0x184   : > { %v884_v45 = vadd.f32 %v2687_v41, %v883_v48  ;;  %v1898_v49 = vpop.f32.mrb[2].mxu0 }
 0x185   : > { %v916_v50 = vmax.f32 %v892_v47, 0.0  ;;  %v895_v51 = vadd.f32 %v1898_v49, %v2687_v41  ;;  %v886_v52 = vpop.f32.mrb[3].mxu0 }
 0x186   : > { %v914_v53 = vmax.f32 %v884_v45, 0.0  ;;  %v887_v54 = vadd.f32 %v2687_v41, %v886_v52 }
 0x187   : > { %v1864_v55 = vpack.c.bf16 %v916_v50, %v916_v50  ;;  %v917_v56 = vmax.f32 %v895_v51, 0.0 }
 0x188   : > { %v1862_v38 = vpack.c.bf16 %v914_v53, %v914_v53  ;;  %v915_v60 = vmax.f32 %v887_v54, 0.0 }
 0x189   : > { %v993_v61 = vshrl.u32 %v1864_v55, 16  ;;  %v1865_v18 = vpack.c.bf16 %v917_v56, %v917_v56  ;;  %v996_v2 = vshll.u32 %v1864_v55, 16 }
 0x18a   : > { %v977_v39 = vshrl.u32 %v1862_v38, 16  ;;  %v1863_v63 = vpack.c.bf16 %v915_v60, %v915_v60  ;;  %v980_v3 = vshll.u32 %v1862_v38, 16 }
 0x18b   : > { %v995_v0 = vrot.slane %v993_v61, 7  ;;  %v1001_v43 = vshrl.u32 %v1865_v18, 16  ;;  %v1004_v14 = vshll.u32 %v1865_v18, 16 }
 0x18c   : > { %v979_v46 = vrot.slane %v977_v39, 7  ;;  %v985_v5 = vshrl.u32 %v1863_v63, 16  ;;  %v988_v17 = vshll.u32 %v1863_v63, 16 }
 0x18d   : > { %v998_v8 = vor.u32 %v996_v2, %v995_v0  ;;  %v999_v9 = vrot.slane %v995_v0, 4  ;;  %v1003_v10 = vrot.slane %v1001_v43, 7 }
 0x18e   : > { %v982_v57 = vor.u32 %v980_v3, %v979_v46  ;;  %v983_v58 = vrot.slane %v979_v46, 4  ;;  %v987_v16 = vrot.slane %v985_v5, 7 }
 0x18f   : > { %v1076_v19 = vsel %vm2694_vm15, %v998_v8, %v1075_v62  ;;  %v1079_v20 = vsel %vm2699_vm10, %v999_v9, %v1078_v11  ;;  %v1006_v21 = vor.u32 %v1004_v14, %v1003_v10  ;;  %v1007_v22 = vrot.slane %v1003_v10, 4 }
 0x190   : > { %1077 = vst [vmem:[#allocation2 + $0x18] sm:$0xf] %v1076_v19  ;;  %1080 = vst [vmem:[#allocation2 + $0x1c] sm:$0x1] %v1079_v20  ;;  %v1061_v29 = vsel %vm2694_vm15, %v982_v57, %v1060_v35  ;;  %v1067_v30 = vsel %vm2699_vm10, %v983_v58, %v1066_v4  ;;  %v990_v31 = vor.u32 %v988_v17, %v987_v16  ;;  %v991_v32 = vrot.slane %v987_v16, 4 }
 0x191   : > { %1062 = vst [vmem:[#allocation2 + $0x8] sm:$0xf] %v1061_v29  ;;  %1068 = vst [vmem:[#allocation2 + $0xc] sm:$0x1] %v1067_v30  ;;  %v1082_v33 = vsel %vm2694_vm15, %v1006_v21, %v1081_v15  ;;  %v1085_v34 = vsel %vm2699_vm10, %v1007_v22, %v1084_v59  ;;  %v1099_v57 = vld [vmem:[#allocation2 + $0x38] sm:$0xf] }
 0x192   : > { %1083 = vst [vmem:[#allocation2 + $0x20] sm:$0xf] %v1082_v33  ;;  %1086 = vst [vmem:[#allocation2 + $0x24] sm:$0x1] %v1085_v34  ;;  %v1070_v13 = vsel %vm2694_vm15, %v990_v31, %v1069_v24  ;;  %v1073_v23 = vsel %vm2699_vm10, %v991_v32, %v1072_v27  ;;  %v1102_v58 = vld [vmem:[#allocation2 + $0x3c] sm:$0x1] }
 0x193   : > { %1071 = vst [vmem:[#allocation2 + $0x10] sm:$0xf] %v1070_v13  ;;  %1074 = vst [vmem:[#allocation2 + $0x14] sm:$0x1] %v1073_v23  ;;  %v1090_v24 = vld [vmem:[#allocation2 + $0x2c] sm:$0x1] }
 0x194   : > { %v1105_v33 = vld [vmem:[#allocation2 + $0x40] sm:$0xf]  ;;  %v1108_v23 = vld [vmem:[#allocation2 + $0x44] sm:$0x1] }
 0x197   : > { %v1118_v36 = vld [vmem:[#allocation2 + $0x1c] sm:$0x1] }
 0x198   : > { %v1138_v25 = vunpack.c.l.bf16 %v1118_v36 }
 0x199   : > { %v1117_v37 = vld [vmem:[#allocation2 + $0x18] ss:$8 sps:$4 sm:$0xff]  }
 0x19a   : > { %v2719_v1 = vunpack.c.l.bf16 %v1117_v37  ;;  %v2721_v40 = vunpack.c.h.bf16 %v1117_v37  ;;  %v1113_v42 = vld [vmem:[#allocation2 + $0x8] ss:$8 sps:$4 sm:$0xff]   ;;  %v1116_v6 = vld [vmem:[#allocation2 + $0x14] sm:$0x1]  ;;  %v1177_v45 = vrot.slane %v1138_v25, 1  ;;  %v1226_v60 = vrot.slane %v1138_v25, 2 }
 0x19b   : > { %v2723_v7 = vunpack.c.l.bf16 %v1113_v42  ;;  %v2725_v12 = vunpack.c.h.bf16 %v1113_v42  ;;  %v1136_v44 = vunpack.c.l.bf16 %v1116_v6 }
 0x19c   : > { %v2139_v47 = vpack.i.bf16 %v2721_v40, %v2719_v1  ;;  %v1176_v48 = vrot.slane %v2719_v1, 1  ;;  %v1225_v52 = vrot.slane %v2719_v1, 2 }
 0x19d   : > { %v2144_v49 = vpack.i.bf16 %v2725_v12, %v2723_v7  ;;  %v1173_v50 = vrot.slane %v2725_v12, 1  ;;  %v1174_v51 = vrot.slane %v1136_v44, 1  ;;  %v1222_v54 = vrot.slane %v2725_v12, 2 }
 0x19e   : > { %2140 = vrot.lane.b32.xlu1 %v2139_v47, %s2317_s12  ;;  %v2736_v53 = vsel %vm482_vm0, %v1176_v48, %v1177_v45  ;;  %v1223_v55 = vrot.slane %v1136_v44, 2  ;;  %v2753_v0 = vsel %vm1215_vm12, %v1225_v52, %v1226_v60  ;;  %v1093_v47 = vld [vmem:[#allocation2 + $0x30] sm:$0xf]  ;;  %v1096_v48 = vld [vmem:[#allocation2 + $0x34] sm:$0x1] }
 0x19f   : > { %v1901_v56 = vpop.f32.mrb[4].mxu0  ;;  %2145 = vrot.lane.b32.xlu0 %v2144_v49, %s2317_s12  ;;  %v2741_v38 = vsel %vm482_vm0, %v1173_v50, %v1174_v51 }
 0x1a0   : > { %v908_v61 = vadd.f32 %v1901_v56, %v2687_v41  ;;  %v899_v18 = vpop.f32.mrb[5].mxu0  ;;  %v2746_v62 = vpack.i.bf16 %v2736_v53, %v2741_v38  ;;  %v2750_v63 = vsel %vm1215_vm12, %v1222_v54, %v1223_v55  ;;  %v1112_v55 = vld [vmem:[#allocation2 + $0x4] sm:$0x1] }
 0x1a1   : > { %v900_v11 = vadd.f32 %v2687_v41, %v899_v18  ;;  %v1902_v39 = vpop.f32.mrb[6].mxu0  ;;  %v2761_v8 = vpack.i.bf16 %v2753_v0, %v2750_v63  ;;  %v1132_v18 = vunpack.c.l.bf16 %v1112_v55 }
 0x1a2   : > { %v920_v2 = vmax.f32 %v908_v61, 0.0  ;;  %v911_v35 = vadd.f32 %v1902_v39, %v2687_v41  ;;  %v902_v43 = vpop.f32.mrb[7].mxu0  ;;  %2160 = vrot.lane.b32.xlu1 %v2746_v62, %s2318_s13  ;;  %v1114_v61 = vld [vmem:[#allocation2 + $0xc] sm:$0x1] }
 0x1a3   : > { %v918_v46 = vmax.f32 %v900_v11, 0.0  ;;  %v903_v3 = vadd.f32 %v2687_v41, %v902_v43  ;;  %v1087_v41 = vld [vmem:[#allocation2 + $0x28] sm:$0xf]  ;;  %v1134_v11 = vunpack.c.l.bf16 %v1114_v61  ;;  %v1168_v43 = vrot.slane %v1132_v18, 1 }
 0x1a4   : > { %v1868_v4 = vpack.c.bf16 %v920_v2, %v920_v2  ;;  %v921_v5 = vmax.f32 %v911_v35, 0.0  ;;  %v1170_v2 = vrot.slane %v2723_v7, 1 }
 0x1a5   : > { %v1866_v9 = vpack.c.bf16 %v918_v46, %v918_v46  ;;  %v919_v10 = vmax.f32 %v903_v3, 0.0  ;;  %v1171_v3 = vrot.slane %v1134_v11, 1 }
 0x1a6   : > { %v1025_v14 = vshrl.u32 %v1868_v4, 16  ;;  %v1869_v15 = vpack.c.bf16 %v921_v5, %v921_v5  ;;  %2165 = vrot.lane.b32.xlu1 %v2761_v8, %s2320_s15  ;;  %v1028_v19 = vshll.u32 %v1868_v4, 16  ;;  %v1217_v4 = vrot.slane %v1132_v18, 2 }
 0x1a7   : > { %v1009_v59 = vshrl.u32 %v1866_v9, 16  ;;  %v1867_v16 = vpack.c.bf16 %v919_v10, %v919_v10  ;;  %v1012_v22 = vshll.u32 %v1866_v9, 16 }
 0x1a8   : > { %v1027_v17 = vrot.slane %v1025_v14, 7  ;;  %v1033_v20 = vshrl.u32 %v1869_v15, 16  ;;  %v1036_v32 = vshll.u32 %v1869_v15, 16 }
 0x1a9   : > { %v1011_v21 = vrot.slane %v1009_v59, 7  ;;  %v1017_v27 = vshrl.u32 %v1867_v16, 16  ;;  %v1020_v25 = vshll.u32 %v1867_v16, 16 }
 0x1aa   : > { %v1030_v29 = vor.u32 %v1028_v19, %v1027_v17  ;;  %v1031_v30 = vrot.slane %v1027_v17, 4  ;;  %v1035_v31 = vrot.slane %v1033_v20, 7  ;;  %v1219_v17 = vrot.slane %v2723_v7, 2 }
 0x1ab   : > { %v1014_v34 = vor.u32 %v1012_v22, %v1011_v21  ;;  %v1015_v13 = vrot.slane %v1011_v21, 4  ;;  %v1019_v36 = vrot.slane %v1017_v27, 7  ;;  %v1130_v21 = vld [vmem:[#allocation2 + $0x4c] sm:$0x1] }
 0x1ac   : > { %v1100_v37 = vsel %vm2694_vm15, %v1030_v29, %v1099_v57  ;;  %v1103_v42 = vsel %vm2699_vm10, %v1031_v30, %v1102_v58  ;;  %v1038_v6 = vor.u32 %v1036_v32, %v1035_v31  ;;  %v1039_v44 = vrot.slane %v1035_v31, 4 }
 0x1ad   : > { %1101 = vst [vmem:[#allocation2 + $0x38] sm:$0xf] %v1100_v37  ;;  %1104 = vst [vmem:[#allocation2 + $0x3c] sm:$0x1] %v1103_v42  ;;  %v1088_v45 = vsel %vm2694_vm15, %v1014_v34, %v1087_v41  ;;  %v1091_v49 = vsel %vm2699_vm10, %v1015_v13, %v1090_v24  ;;  %v1022_v50 = vor.u32 %v1020_v25, %v1019_v36  ;;  %v1023_v51 = vrot.slane %v1019_v36, 4 }
 0x1ae   : > { %1089 = vst [vmem:[#allocation2 + $0x28] sm:$0xf] %v1088_v45  ;;  %1092 = vst [vmem:[#allocation2 + $0x2c] sm:$0x1] %v1091_v49  ;;  %v1106_v52 = vsel %vm2694_vm15, %v1038_v6, %v1105_v33  ;;  %v1109_v54 = vsel %vm2699_vm10, %v1039_v44, %v1108_v23  ;;  %v1172_v57 = vsel %vm482_vm0, %v1170_v2, %v1171_v3  ;;  %v1220_v24 = vrot.slane %v1134_v11, 2 }
 0x1af   : > { %1107 = vst [vmem:[#allocation2 + $0x40] sm:$0xf] %v1106_v52  ;;  %1110 = vst [vmem:[#allocation2 + $0x44] sm:$0x1] %v1109_v54  ;;  %v1094_v56 = vsel %vm2694_vm15, %v1022_v50, %v1093_v47  ;;  %v1097_v60 = vsel %vm2699_vm10, %v1023_v51, %v1096_v48  ;;  %v1150_v34 = vunpack.c.l.bf16 %v1130_v21  ;;  %v2169_v47 = vpack.i.bf16 %v2741_v38, %v1172_v57  ;;  %v1120_v51 = vld [vmem:[#allocation2 + $0x24] sm:$0x1] }
 0x1b0   : > { %1095 = vst [vmem:[#allocation2 + $0x30] sm:$0xf] %v1094_v56  ;;  %1098 = vst [vmem:[#allocation2 + $0x34] sm:$0x1] %v1097_v60  ;;  %v2797_v32 = vsel %vm1215_vm12, %v1219_v17, %v1220_v24  ;;  %v1140_v61 = vunpack.c.l.bf16 %v1120_v51  ;;  %v1228_v17 = vrot.slane %v2721_v40, 2 }
 0x1b1   : > { %v1371_v45 = vrot.slane %v1150_v34, 1  ;;  %v1398_v18 = vrot.slane %v1150_v34, 2 }
 0x1b4   : > { %v1111_v39 = vld [vmem:[#allocation2] ss:$56 sps:$4 sm:$0xff]   ;;  %v1126_v46 = vld [vmem:[#allocation2 + $0x3c] sm:$0x1] }
 0x1b5   : > { %v2782_v35 = vunpack.c.l.bf16 %v1111_v39  ;;  %v2786_v10 = vunpack.c.h.bf16 %v1111_v39  ;;  %v1146_v58 = vunpack.c.l.bf16 %v1126_v46  ;;  %v1122_v42 = vld [vmem:[#allocation2 + $0x2c] sm:$0x1] }
 0x1b6   : > { %v1127_v5 = vld [vmem:[#allocation2 + $0x28] ss:$24 sps:$4 sm:$0xff]   ;;  %v1128_v26 = vld [vmem:[#allocation2 + $0x44] sm:$0x1]  ;;  %v1142_v55 = vunpack.c.l.bf16 %v1122_v42 }
 0x1b7   : > { %v1167_v9 = vrot.slane %v2782_v35, 1  ;;  %v1216_v28 = vrot.slane %v2782_v35, 2  ;;  %v1147_v14 = vunpack.c.h.bf16 %v1127_v5  ;;  %v1123_v15 = vld [vmem:[#allocation2 + $0x30] ss:$24 sps:$4 sm:$0xff]   ;;  %v1148_v59 = vunpack.c.l.bf16 %v1128_v26  ;;  %v1124_v56 = vld [vmem:[#allocation2 + $0x34] sm:$0x1] }
 0x1b8   : > { %v1149_v41 = vunpack.c.h.bf16 %v1123_v15  ;;  %v1188_v30 = vrot.slane %v2786_v10, 1  ;;  %v1189_v31 = vrot.slane %v1146_v58, 1  ;;  %v1237_v6 = vrot.slane %v2786_v10, 2 }
 0x1b9   : > { %v1169_v16 = vsel %vm482_vm0, %v1167_v9, %v1168_v43  ;;  %v2174_v19 = vpack.i.bf16 %v1147_v14, %v2786_v10  ;;  %v1218_v22 = vsel %vm1215_vm12, %v1216_v28, %v1217_v4  ;;  %v1290_v27 = vrot.slane %v1147_v14, 1 }
 0x1ba   : > { %v2149_v20 = vpack.i.bf16 %v1172_v57, %v1169_v16  ;;  %v1291_v29 = vrot.slane %v1148_v59, 1  ;;  %v2179_v33 = vpack.i.bf16 %v1149_v41, %v1147_v14  ;;  %v2154_v13 = vpack.i.bf16 %v2797_v32, %v1218_v22 }
 0x1bb   : > { %2175 = vrot.lane.b32.xlu1 %v2174_v19, %s2317_s12  ;;  %v1317_v36 = vrot.slane %v1147_v14, 2  ;;  %v1318_v25 = vrot.slane %v1148_v59, 2  ;;  %v1190_v37 = vsel %vm482_vm0, %v1188_v30, %v1189_v31  ;;  %v1238_v44 = vrot.slane %v1146_v58, 2 }
 0x1bc   : > { %2150 = vrot.lane.b32.xlu0 %v2149_v20, %s2318_s13  ;;  %v1292_v23 = vsel %vm482_vm0, %v1290_v27, %v1291_v29  ;;  %v2806_v49 = vunpack.c.l.bf16 %v1127_v5  ;;  %v2808_v50 = vunpack.c.l.bf16 %v1123_v15  ;;  %v1370_v54 = vrot.slane %v1149_v41, 1 }
 0x1bd   : > { %v2204_v48 = vpack.i.bf16 %v1292_v23, %v1190_v37  ;;  %v1319_v52 = vsel %vm1215_vm12, %v1317_v36, %v1318_v25  ;;  %v1239_v60 = vsel %vm1215_vm12, %v1237_v6, %v1238_v44  ;;  %v1397_v2 = vrot.slane %v1149_v41, 2  ;;  %v2303_v36 = vld [vmem:[%s3075_s3 + $0x8] sm:$0xff]  }
 0x1be   : > { %v2209_v38 = vpack.i.bf16 %v1319_v52, %v1239_v60  ;;  %v2184_v11 = vpack.i.bf16 %v2808_v50, %v2806_v49  ;;  %v1372_v39 = vsel %vm482_vm0, %v1370_v54, %v1371_v45  ;;  %v1144_v43 = vunpack.c.l.bf16 %v1124_v56 }
 0x1bf   : > { %2180 = vrot.lane.b32.xlu1 %v2179_v33, %s2322_s21  ;;  %v1182_v46 = vrot.slane %v2806_v49, 1  ;;  %v1183_v3 = vrot.slane %v1142_v55, 1  ;;  %v1179_v4 = vrot.slane %v2721_v40, 1  ;;  %v1180_v5 = vrot.slane %v1140_v61, 1 }
 0x1c0   : > { %2155 = vrot.lane.b32.xlu0 %v2154_v13, %s2320_s15  ;;  %v2214_v26 = vpack.i.bf16 %v1372_v39, %v1292_v23  ;;  %v2189_v9 = vpack.i.bf16 %v2786_v10, %v2808_v50  ;;  %v1399_v28 = vsel %vm1215_vm12, %v1397_v2, %v1398_v18  ;;  %v1185_v14 = vrot.slane %v2808_v50, 1  ;;  %v2302_v13 = vld [vmem:[%s3075_s3] sm:$0xff]  }
 0x1c1   : > { %v1186_v15 = vrot.slane %v1144_v43, 1  ;;  %v1184_v57 = vsel %vm482_vm0, %v1182_v46, %v1183_v3  ;;  %v1231_v58 = vrot.slane %v2806_v49, 2  ;;  %v1232_v59 = vrot.slane %v1142_v55, 2  ;;  %1927 = vmatprep.subr.bf16.mxu1 %v2302_v13  ;;  %1903 = vmatprep.subr.bf16.mxu0 %v2302_v13 }
 0x1c2   : > { %v1181_v16 = vsel %vm482_vm0, %v1179_v4, %v1180_v5  ;;  %v1229_v19 = vrot.slane %v1140_v61, 2  ;;  %v2219_v41 = vpack.i.bf16 %v1399_v28, %v1319_v52  ;;  %v1234_v22 = vrot.slane %v2808_v50, 2  ;;  %1930 = vmatpush3.bf16.msra.mxu1 %v2302_v13  ;;  %1904 = vmatpush3.bf16.msra.mxu0 %v2302_v13 }
 0x1c3   : > { %2205 = vrot.lane.b32.xlu1 %v2204_v48, %s2319_s14  ;;  %v2194_v20 = vpack.i.bf16 %v1184_v57, %v1181_v16  ;;  %v1187_v21 = vsel %vm482_vm0, %v1185_v14, %v1186_v15  ;;  %v1235_v24 = vrot.slane %v1144_v43, 2  ;;  %v1233_v27 = vsel %vm1215_vm12, %v1231_v58, %v1232_v59  ;;  %1928 = vmatprep.subr.bf16.mxu1 %v2303_v36 }
 0x1c4   : > { %2170 = vrot.lane.b32.xlu0 %v2169_v47, %s2319_s14  ;;  %v1230_v29 = vsel %vm1215_vm12, %v1228_v17, %v1229_v19  ;;  %v2224_v30 = vpack.i.bf16 %v1190_v37, %v1187_v21  ;;  %v2239_v23 = vpack.i.bf16 %v2750_v63, %v2797_v32  ;;  %v2234_v25 = vpack.i.bf16 %v1181_v16, %v2736_v53  ;;  %v2304_v63 = vld [vmem:[%s3075_s3 + $0x10] ss:$0 sps:$4 sm:$0x33]  }
 0x1c5   : > { %v2199_v31 = vpack.i.bf16 %v1233_v27, %v1230_v29  ;;  %v1236_v33 = vsel %vm1215_vm12, %v1234_v22, %v1235_v24  ;;  %v2249_v37 = vpack.i.bf16 %v1187_v21, %v1184_v57  ;;  %1905 = vmatprep.subr.bf16.mxu0 %v2303_v36  ;;  %v2244_v32 = vpack.i.bf16 %v1230_v29, %v2753_v0  ;;  %v1607_v0 = vld [vmem:[%s3078_s6] sm:$0x3] }
 0x1c6   : > { %v2229_v34 = vpack.i.bf16 %v1239_v60, %v1236_v33  ;;  %1931 = vmatpush3.bf16.msra.mxu1 %v2303_v36  ;;  %v1532_v53 = vsel %vm845_vm1, %v2304_v63, 0  ;;  %v2254_v42 = vpack.i.bf16 %v1236_v33, %v1233_v27  ;;  %1906 = vmatpush3.bf16.msra.mxu0 %v2303_v36  ;;  %v2274_v6 = vpack.i.bf16 %v2806_v49, %v2721_v40 }
 0x1c7   : > { %2210 = vrot.lane.b32.xlu1 %v2209_v38, %s2321_s20  ;;  %1959 = vmatprep.subr.msk.bf16.mxu1 %vm845_vm1, %v2304_v63  ;;  %v2269_v44 = vpack.i.bf16 %v2719_v1, %v2725_v12  ;;  %vm3086_vm0 = vcmask 293888  }
 0x1c8   : > { %2185 = vrot.lane.b32.xlu0 %v2184_v11, %s2317_s12  ;;  %1958 = vmatprep.subr.msk.bf16.mxu0 %vm845_vm1, %v2304_v63 }
 0x1ca   : > { %1932 = vmatpush3.bf16.msra.mxu1 %v1532_v53  ;;  %1908 = vmatpush3.bf16.msra.mxu0 %v1532_v53 }
 0x1cb   : > { %2215 = vrot.lane.b32.xlu1 %v2214_v26, %s2323_s22  ;;  %1960 = vmatprep.subr.msk.bf16.mxu1 %vm845_vm1, %v1607_v0 }
 0x1cc   : > { %2190 = vrot.lane.b32.xlu0 %v2189_v9, %s2322_s21  ;;  %v2915_v9 = vsel %vm845_vm1, %v1607_v0, 0  ;;  %vm3087_vm1 = vmmov %vm3086_vm0 }
 0x1cf   : > { %2220 = vrot.lane.b32.xlu1 %v2219_v41, %s2324_s25 }
 0x1d0   : > { %2195 = vrot.lane.b32.xlu0 %v2194_v20, %s2318_s13 }
 0x1d3   : > { %2225 = vrot.lane.b32.xlu1 %v2224_v30, %s2318_s13 }
 0x1d4   : > { %2200 = vrot.lane.b32.xlu0 %v2199_v31, %s2320_s15 }
 0x1d7   : > { %2230 = vrot.lane.b32.xlu1 %v2229_v34, %s2320_s15 }
 0x1d8   : > { %2240 = vrot.lane.b32.xlu0 %v2239_v23, %s2321_s20 }
 0x1db   : > { %2235 = vrot.lane.b32.xlu1 %v2234_v25, %s2319_s14 }
 0x1dc   : > { %2250 = vrot.lane.b32.xlu0 %v2249_v37, %s2319_s14 }
 0x1df   : > { %2245 = vrot.lane.b32.xlu1 %v2244_v32, %s2321_s20 }
 0x1e0   : > { %2255 = vrot.lane.b32.xlu0 %v2254_v42, %s2321_s20 }
 0x1e3   : > { %2275 = vrot.lane.b32.xlu1 %v2274_v6, %s2322_s21 }
 0x1e4   : > { %2260 = vrot.lane.b32.xlu0 %v2224_v30, %s2323_s22 }
 0x1e7   : > { %2285 = vrot.lane.b32.xlu1 %v2194_v20, %s2323_s22 }
 0x1e8   : > { %2265 = vrot.lane.b32.xlu0 %v2229_v34, %s2324_s25 }
 0x1eb   : > { %2295 = vrot.lane.b32.xlu1 %v2199_v31, %s2324_s25 }
 0x1ec   : > { %2270 = vrot.lane.b32.xlu0 %v2269_v44, %s2322_s21 }
 0x1f0   : > { %2280 = vrot.lane.b32.xlu0 %v2746_v62, %s2323_s22 }
 0x1f4   : > { %2290 = vrot.lane.b32.xlu0 %v2761_v8, %s2324_s25 }
 0x210   : > { %v2892_v47 = vpop.permute.xlu1 %2140 }
 0x211   : > { %v2894_v51 = vpop.permute.xlu0 %2145  ;;  %v2143_v4 = vunpack.i.h.bf16 %v2892_v47  ;;  %v2142_v5 = vunpack.i.l.bf16 %v2892_v47 }
 0x212   : > { %v2147_v36 = vunpack.i.l.bf16 %v2894_v51 }
 0x214   : > { %v2161_v48 = vpop.permute.xlu1 %2160 }
 0x215   : > { %v2163_v28 = vunpack.i.h.bf16 %v2161_v48  ;;  %v2162_v14 = vunpack.i.l.bf16 %v2161_v48 }
 0x217   : > { %v1427_v25 = vsel %vm729_vm2, %v2719_v1, %v2163_v28  ;;  %v1426_v37 = vsel %vm729_vm2, %v2725_v12, %v2162_v14 }
 0x218   : > { %v2166_v45 = vpop.permute.xlu1 %2165 }
 0x219   : > { %v2168_v41 = vunpack.i.h.bf16 %v2166_v45  ;;  %v2167_v20 = vunpack.i.l.bf16 %v2166_v45 }
 0x21b   : > { %v2936_v63 = vsel %vm738_vm3, %v1426_v37, %v2167_v20  ;;  %v2939_v32 = vsel %vm738_vm3, %v1427_v25, %v2168_v41 }
 0x22d   : > { %v2176_v52 = vpop.permute.xlu1 %2175 }
 0x22e   : > { %v2896_v54 = vpop.permute.xlu0 %2150  ;;  %v2178_v59 = vunpack.i.h.bf16 %v2176_v52  ;;  %v2177_v16 = vunpack.i.l.bf16 %v2176_v52 }
 0x22f   : > { %v2153_v28 = vunpack.i.h.bf16 %v2896_v54 }
 0x231   : > { %v2898_v55 = vpop.permute.xlu1 %2180 }
 0x232   : > { %v2900_v56 = vpop.permute.xlu0 %2155  ;;  %v2183_v12 = vunpack.i.h.bf16 %v2898_v55  ;;  %v2182_v45 = vunpack.i.l.bf16 %v2898_v55  ;;  %v2152_v55 = vunpack.i.l.bf16 %v2896_v54 }
 0x233   : > { %v2158_v14 = vunpack.i.h.bf16 %v2900_v56 }
 0x235   : > { %v2206_v60 = vpop.permute.xlu1 %2205 }
 0x236   : > { %v2902_v61 = vpop.permute.xlu0 %2170  ;;  %v2208_v33 = vunpack.i.h.bf16 %v2206_v60  ;;  %v2207_v34 = vunpack.i.l.bf16 %v2206_v60 }
 0x239   : > { %v2211_v62 = vpop.permute.xlu1 %2210 }
 0x23a   : > { %v2904_v38 = vpop.permute.xlu0 %2185  ;;  %v2213_v1 = vunpack.i.h.bf16 %v2211_v62  ;;  %v2212_v44 = vunpack.i.l.bf16 %v2211_v62 }
 0x23b   : > { %v2187_v62 = vunpack.i.l.bf16 %v2904_v38 }
 0x23d   : > { %v2906_v8 = vpop.permute.xlu1 %2215 }
 0x23e   : > { %v2908_v18 = vpop.permute.xlu0 %2190  ;;  %v2218_v41 = vunpack.i.h.bf16 %v2906_v8  ;;  %v2217_v20 = vunpack.i.l.bf16 %v2906_v8  ;;  %v1425_v8 = vsel %vm729_vm2, %v2723_v7, %v2153_v28 }
 0x241   : > { %v2910_v11 = vpop.permute.xlu1 %2220 }
 0x242   : > { %v2196_v39 = vpop.permute.xlu0 %2195 }
 0x243   : > { %v2198_v24 = vunpack.i.h.bf16 %v2196_v39  ;;  %v2197_v27 = vunpack.i.l.bf16 %v2196_v39 }
 0x245   : > { %v2226_v2 = vpop.permute.xlu1 %2225  ;;  %v1429_v6 = vsel %vm729_vm2, %v2806_v49, %v2198_v24  ;;  %v1428_v0 = vsel %vm729_vm2, %v2721_v40, %v2197_v27  ;;  %v2188_v40 = vunpack.i.h.bf16 %v2904_v38 }
 0x246   : > { %v2201_v43 = vpop.permute.xlu0 %2200  ;;  %v2228_v46 = vunpack.i.h.bf16 %v2226_v2  ;;  %v2227_v3 = vunpack.i.l.bf16 %v2226_v2 }
 0x247   : > { %v2202_v13 = vunpack.i.l.bf16 %v2201_v43 }
 0x248   : > { %v1431_v17 = vsel %vm729_vm2, %v2786_v10, %v2228_v46  ;;  %v1430_v19 = vsel %vm729_vm2, %v2808_v50, %v2227_v3  ;;  %v2203_v10 = vunpack.i.h.bf16 %v2201_v43  ;;  %v2148_v50 = vunpack.i.h.bf16 %v2894_v51 }
 0x249   : > { %v2231_v26 = vpop.permute.xlu1 %2230  ;;  %v1436_v52 = vsel %vm738_vm3, %v1428_v0, %v2202_v13  ;;  %v2223_v13 = vunpack.i.h.bf16 %v2910_v11 }
 0x24a   : > { %v2917_v15 = vpop.permute.xlu0 %2240  ;;  %v2233_v57 = vunpack.i.h.bf16 %v2231_v26  ;;  %v2232_v58 = vunpack.i.l.bf16 %v2231_v26  ;;  %v1437_v60 = vsel %vm738_vm3, %v1429_v6, %v2203_v10  ;;  %v1424_v10 = vsel %vm729_vm2, %v2782_v35, %v2152_v55 }
 0x24c   : > { %v1438_v21 = vsel %vm738_vm3, %v1430_v19, %v2232_v58  ;;  %v1439_v22 = vsel %vm738_vm3, %v1431_v17, %v2233_v57  ;;  %v2157_v57 = vunpack.i.l.bf16 %v2900_v56 }
 0x24d   : > { %v1446_v29 = vsel %vm747_vm4, %v1438_v21, %v2177_v16  ;;  %v1447_v30 = vsel %vm747_vm4, %v1439_v22, %v2178_v59  ;;  %v2927_v31 = vpop.permute.xlu1 %2235  ;;  %v1444_v59 = vsel %vm747_vm4, %v1436_v52, %v2187_v62  ;;  %v1445_v16 = vsel %vm747_vm4, %v1437_v60, %v2188_v40 }
 0x24e   : > { %v2251_v23 = vpop.permute.xlu0 %2250  ;;  %v1454_v53 = vsel %vm756_vm5, %v1446_v29, %v2207_v34  ;;  %v1455_v42 = vsel %vm756_vm5, %v1447_v30, %v2208_v33  ;;  %v2193_v29 = vunpack.i.h.bf16 %v2908_v18  ;;  %v2192_v30 = vunpack.i.l.bf16 %v2908_v18 }
 0x24f   : > { %v2253_v2 = vunpack.i.h.bf16 %v2251_v23  ;;  %v2252_v43 = vunpack.i.l.bf16 %v2251_v23  ;;  %v1462_v49 = vsel %vm765_vm6, %v1454_v53, %v2212_v44  ;;  %v1463_v46 = vsel %vm765_vm6, %v1455_v42, %v2213_v1 }
 0x250   : > { %v1470_v19 = vsel %vm774_vm7, %v1462_v49, %v2182_v45  ;;  %v1471_v38 = vsel %vm774_vm7, %v1463_v46, %v2183_v12  ;;  %v2222_v23 = vunpack.i.l.bf16 %v2910_v11  ;;  %v1432_v44 = vsel %vm738_vm3, %v1424_v10, %v2157_v57  ;;  %v2305_v49 = vld [vmem:[%s2886_s19] sm:$0xff]  }
 0x251   : > { %v2947_v48 = vpop.permute.xlu1 %2245  ;;  %v1452_v54 = vsel %vm756_vm5, %v1444_v59, %v2252_v43  ;;  %v1453_v21 = vsel %vm756_vm5, %v1445_v16, %v2253_v2  ;;  %v1478_v33 = vsel %vm783_vm8, %v1470_v19, %v2217_v20  ;;  %v1479_v34 = vsel %vm783_vm8, %v1471_v38, %v2218_v41 }
 0x252   : > { %v2256_v39 = vpop.permute.xlu0 %2255  ;;  %v1486_v1 = vsel %vm792_vm9, %v1478_v33, %v2222_v23  ;;  %v1487_v35 = vsel %vm792_vm9, %v1479_v34, %v2223_v13  ;;  %v1433_v11 = vsel %vm738_vm3, %v1425_v8, %v2158_v14  ;;  %v2238_v52 = vunpack.i.h.bf16 %v2927_v31  ;;  %vm3088_vm3 = vmmov %vm3086_vm0 }
 0x253   : > { %v2258_v3 = vunpack.i.h.bf16 %v2256_v39  ;;  %v2257_v26 = vunpack.i.l.bf16 %v2256_v39  ;;  %v2237_v60 = vunpack.i.l.bf16 %v2927_v31  ;;  %v1442_v39 = vsel %vm747_vm4, %v2936_v63, %v2142_v5 }
 0x254   : > { %v1443_v46 = vsel %vm747_vm4, %v2939_v32, %v2143_v4  ;;  %v2248_v40 = vunpack.i.h.bf16 %v2947_v48  ;;  %v2247_v62 = vunpack.i.l.bf16 %v2947_v48  ;;  %v2173_v31 = vunpack.i.h.bf16 %v2902_v61 }
 0x255   : > { %v2961_v58 = vpop.permute.xlu1 %2275  ;;  %v1460_v56 = vsel %vm765_vm6, %v1452_v54, %v2257_v26  ;;  %v1461_v22 = vsel %vm765_vm6, %v1453_v21, %v2258_v3  ;;  %v1491_v3 = vpack.c.bf16 %v1487_v35, %v1486_v1  ;;  %v2172_v26 = vunpack.i.l.bf16 %v2902_v61  ;;  %v2306_v54 = vld [vmem:[%s2886_s19 + $0x8] sm:$0xff]   ;;  %v1841_v35 = vld [vmem:[%s3076_s4] ss:$0 sm:$0xff] }
 0x256   : > { %v2261_v17 = vpop.permute.xlu0 %2260  ;;  %v1468_v42 = vsel %vm774_vm7, %v1460_v56, %v2192_v30  ;;  %v1469_v18 = vsel %vm774_vm7, %v1461_v22, %v2193_v29  ;;  %v1440_v5 = vsel %vm747_vm4, %v1432_v44, %v2147_v36  ;;  %v1441_v47 = vsel %vm747_vm4, %v1433_v11, %v2148_v50  ;;  %v2307_v29 = vld [vmem:[%s2886_s19 + $0x10] sm:$0xff]   ;;  %vm3089_vm4 = vmmov %vm3086_vm0  ;;  %v1849_v44 = vld [vmem:[%s3079_s7] ss:$0 sm:$0xff] }
 0x257   : > { %v2263_v24 = vunpack.i.h.bf16 %v2261_v17  ;;  %v2262_v27 = vunpack.i.l.bf16 %v2261_v17  ;;  %v2243_v4 = vunpack.i.h.bf16 %v2917_v15  ;;  %v2242_v63 = vunpack.i.l.bf16 %v2917_v15 }
 0x258   : > { %v2278_v32 = vunpack.i.h.bf16 %v2961_v58  ;;  %v2277_v48 = vunpack.i.l.bf16 %v2961_v58  ;;  %v1450_v28 = vsel %vm756_vm5, %v1442_v39, %v2237_v60  ;;  %v1451_v36 = vsel %vm756_vm5, %v1443_v46, %v2238_v52 }
 0x259   : > { %v2286_v6 = vpop.permute.xlu1 %2285  ;;  %v1476_v0 = vsel %vm783_vm8, %v1468_v42, %v2262_v27  ;;  %v1477_v7 = vsel %vm783_vm8, %v1469_v18, %v2263_v24  ;;  %v1458_v15 = vsel %vm765_vm6, %v1450_v28, %v2247_v62  ;;  %v1459_v14 = vsel %vm765_vm6, %v1451_v36, %v2248_v40 }
 0x25a   : > { %v2266_v25 = vpop.permute.xlu0 %2265  ;;  %v2288_v50 = vunpack.i.h.bf16 %v2286_v6  ;;  %v2287_v55 = vunpack.i.l.bf16 %v2286_v6  ;;  %v1448_v38 = vsel %vm756_vm5, %v1440_v5, %v2172_v26  ;;  %v1466_v41 = vsel %vm774_vm7, %v1458_v15, %v2277_v48  ;;  %v2308_v6 = vld [vmem:[%s2886_s19 + $0x18] sm:$0xff]  }
 0x25b   : > { %v2268_v37 = vunpack.i.h.bf16 %v2266_v25  ;;  %v2267_v53 = vunpack.i.l.bf16 %v2266_v25  ;;  %v1467_v20 = vsel %vm774_vm7, %v1459_v14, %v2278_v32  ;;  %v1456_v21 = vsel %vm765_vm6, %v1448_v38, %v2242_v63 }
 0x25c   : > { %v1474_v22 = vsel %vm783_vm8, %v1466_v41, %v2287_v55  ;;  %v1475_v24 = vsel %vm783_vm8, %v1467_v20, %v2288_v50  ;;  %v1947_v60 = vadd.f32 %v1849_v44, %v1841_v35 }
 0x25d   : > { %v1484_v12 = vsel %vm792_vm9, %v1476_v0, %v2267_v53  ;;  %v1485_v45 = vsel %vm792_vm9, %v1477_v7, %v2268_v37  ;;  %v2296_v61 = vpop.permute.xlu1 %2295 }
 0x25e   : > { %v2271_v2 = vpop.permute.xlu0 %2270  ;;  %v1490_v43 = vpack.c.bf16 %v1485_v45, %v1484_v12  ;;  %v2298_v17 = vunpack.i.h.bf16 %v2296_v61  ;;  %v2297_v19 = vunpack.i.l.bf16 %v2296_v61 }
 0x25f   : > { %v2273_v57 = vunpack.i.h.bf16 %v2271_v2  ;;  %v2272_v58 = vunpack.i.l.bf16 %v2271_v2 }
 0x260   : > { %1913 = vmatprep.mubr.msk.bf16.mxu1 %vm3086_vm0, %v1490_v43  ;;  %v1482_v23 = vsel %vm792_vm9, %v1474_v22, %v2297_v19  ;;  %v1483_v25 = vsel %vm792_vm9, %v1475_v24, %v2298_v17 }
 0x261   : > { %1914 = vmatmul.mubr.msk.bf16.vlgmr.msra.gmra.mrb[0].mxu1 %vm3087_vm1, %v1491_v3  ;;  %v1464_v30 = vsel %vm774_vm7, %v1456_v21, %v2272_v58  ;;  %v1489_v18 = vpack.c.bf16 %v1483_v25, %v1482_v23 }
 0x262   : > { %v2281_v51 = vpop.permute.xlu0 %2280  ;;  %1918 = vmatpush3.bf16.msra.mxu1 %v2915_v9  ;;  %1919 = vmatprep.mubr.msk.bf16.mxu1 %vm729_vm2, %v2305_v49  ;;  %v1449_v9 = vsel %vm756_vm5, %v1441_v47, %v2173_v31 }
 0x263   : > { %v2283_v59 = vunpack.i.h.bf16 %v2281_v51  ;;  %v2282_v16 = vunpack.i.l.bf16 %v2281_v51  ;;  %v1457_v56 = vsel %vm765_vm6, %v1449_v9, %v2243_v4 }
 0x264   : > { %v1465_v33 = vsel %vm774_vm7, %v1457_v56, %v2273_v57 }
 0x265   : > { %v1472_v10 = vsel %vm783_vm8, %v1464_v30, %v2282_v16  ;;  %v1473_v13 = vsel %vm783_vm8, %v1465_v33, %v2283_v59 }
 0x266   : > { %v2291_v27 = vpop.permute.xlu0 %2290 }
 0x267   : > { %v2293_v34 = vunpack.i.h.bf16 %v2291_v27  ;;  %v2292_v8 = vunpack.i.l.bf16 %v2291_v27 }
 0x269   : > { %v1480_v37 = vsel %vm792_vm9, %v1472_v10, %v2292_v8  ;;  %v1481_v53 = vsel %vm792_vm9, %v1473_v13, %v2293_v34  ;;  %1920 = vmatmul.mubr.msk.bf16.vlgmr.msra.gmra.mrb[4].mxu1 %vm729_vm2, %v2306_v54 }
 0x26a   : > { %v1488_v42 = vpack.c.bf16 %v1481_v53, %v1480_v37  ;;  %1923 = vmatprep.mubr.msk.bf16.mxu1 %vm729_vm2, %v2307_v29 }
 0x26c   : > { %1909 = vmatprep.mubr.msk.bf16.mxu0 %vm3088_vm3, %v1488_v42 }
 0x26d   : > { %1910 = vmatmul.mubr.msk.bf16.vlgmr.msra.gmra.mrb[8].mxu0 %vm3089_vm4, %v1489_v18 }
 0x271   : > { %1924 = vmatmul.mubr.msk.bf16.gmra.mrb[0].mxu1 %vm729_vm2, %v2308_v6 }
 0x33c   : > { %v1921_v0 = vpop.f32.mrb[4].mxu1 }
 0x33d   : > { %v1684_v7 = vpop.f32.mrb[5].mxu1 }
 0x33e   : > { %v1922_v1 = vpop.f32.mrb[6].mxu1 }
 0x33f   : > { %v1687_v11 = vpop.f32.mrb[7].mxu1 }
 0x340   : > { %v1911_v12 = vpop.f32.mrb[8].mxu0 }
 0x341   : > { %v1577_v45 = vadd.f32 %v1911_v12, %v1841_v35  ;;  %v1568_v52 = vpop.f32.mrb[9].mxu0 }
 0x342   : > { %v1569_v39 = vadd.f32 %v1841_v35, %v1568_v52  ;;  %v1912_v2 = vpop.f32.mrb[10].mxu0 }
 0x343   : > { %v1934_v43 = vadd.f32 %v1921_v0, %v1577_v45  ;;  %v1580_v49 = vadd.f32 %v1912_v2, %v1841_v35  ;;  %v1571_v46 = vpop.f32.mrb[11].mxu0 }
 0x344   : > { %v1937_v40 = vadd.f32 %v1684_v7, %v1569_v39  ;;  %v1925_v62 = vpop.f32.mrb[0].mxu1  ;;  %v1572_v3 = vadd.f32 %v1841_v35, %v1571_v46 }
 0x345   : > { %v1935_v31 = vadd.f32 %v1934_v43, %v1849_v44  ;;  %v1940_v26 = vadd.f32 %v1849_v44, %v1580_v49  ;;  %v1946_v5 = vadd.f32 %v1947_v60, %v1925_v62  ;;  %v1700_v47 = vpop.f32.mrb[1].mxu1 }
 0x346   : > { %v1938_v4 = vadd.f32 %v1937_v40, %v1849_v44  ;;  %v1943_v63 = vadd.f32 %v1849_v44, %v1572_v3  ;;  %v1948_v32 = vadd.f32 %v1947_v60, %v1700_v47  ;;  %v1926_v48 = vpop.f32.mrb[2].mxu1 }
 0x347   : > { %v1725_v61 = vmax.f32 %v1935_v31, 0.0  ;;  %v1941_v28 = vadd.f32 %v1940_v26, %v1922_v1  ;;  %v1729_v36 = vmax.f32 %v1946_v5, 0.0  ;;  %v1950_v51 = vadd.f32 %v1947_v60, %v1926_v48  ;;  %v1703_v50 = vpop.f32.mrb[3].mxu1 }
 0x348   : > { %v1723_v55 = vmax.f32 %v1938_v4, 0.0  ;;  %v1944_v15 = vadd.f32 %v1943_v63, %v1687_v11  ;;  %v1727_v14 = vmax.f32 %v1948_v32, 0.0  ;;  %v1952_v57 = vadd.f32 %v1947_v60, %v1703_v50 }
 0x349   : > { %v1733_v58 = vpack.c.bf16 %v1725_v61, %v1725_v61  ;;  %v1726_v59 = vmax.f32 %v1941_v28, 0.0  ;;  %v1737_v16 = vpack.c.bf16 %v1729_v36, %v1729_v36  ;;  %v1730_v17 = vmax.f32 %v1950_v51, 0.0 }
 0x34a   : > { %v1731_v19 = vpack.c.bf16 %v1723_v55, %v1723_v55  ;;  %v1724_v38 = vmax.f32 %v1944_v15, 0.0  ;;  %v1735_v9 = vpack.c.bf16 %v1727_v14, %v1727_v14  ;;  %v1728_v41 = vmax.f32 %v1952_v57, 0.0 }
 0x34b   : > { %1741 = vst.msk [vmem:[%s330_s26 + $0x8] sm:$0xf] %vm922_vm11, %v1733_v58  ;;  %v1734_v20 = vpack.c.bf16 %v1726_v59, %v1726_v59  ;;  %1745 = vst.msk [vmem:[%s330_s26 + $0x18] sm:$0xf] %vm922_vm11, %v1737_v16  ;;  %v1738_v54 = vpack.c.bf16 %v1730_v17, %v1730_v17 }
 0x34c   : > { %1739 = vst.msk [vmem:[%s330_s26] sm:$0xf] %vm922_vm11, %v1731_v19  ;;  %v1732_v21 = vpack.c.bf16 %v1724_v38, %v1724_v38  ;;  %1743 = vst.msk [vmem:[%s330_s26 + $0x10] sm:$0xf] %vm922_vm11, %v1735_v9  ;;  %v1736_v56 = vpack.c.bf16 %v1728_v41, %v1728_v41 }
 0x34d   : > { %1742 = vst.msk [vmem:[%s330_s26 + $0xc] sm:$0xf] %vm922_vm11, %v1734_v20  ;;  %1746 = vst.msk [vmem:[%s330_s26 + $0x1c] sm:$0xf] %vm922_vm11, %v1738_v54 }
 0x34e   : > { %1740 = vst.msk [vmem:[%s330_s26 + $0x4] sm:$0xf] %vm922_vm11, %v1732_v21  ;;  %1744 = vst.msk [vmem:[%s330_s26 + $0x14] sm:$0xf] %vm922_vm11, %v1736_v56 }
 0x34f PF: > { %s18_s27 = sadd.s32 1, %s2315_s27  }
 0x350   : > { %p15_p5 = scmp.ge.s32.totalorder %s18_s27, 4  }
 0x352   :  { %17 = sbr.rel (!%p15_p5) target bundleno = 1 (0x1), region = 86 }

</bundles_post_ra>
